<compile_context>
chip_gen: v5e
topology: v5e:2x2
jax: 0.10.0
libtpu: 0.0.40
codegen_flags: <defaults>
</compile_context>

<pallas_src>
import jax
import jax.numpy as jnp
from jax import lax
from jax.experimental import pallas as pl
from jax.experimental.pallas import tpu as pltpu

HIDDEN = 50   # fixed: nn.Linear(50, 1) is applied to the LSTM hidden output
GP = 128      # per-gate lane-padded width
G4 = 4 * GP   # padded gate axis (i, f, g, o blocks of 128 lanes each)


def _sigmoid(z):
    # Exact identity: sigmoid(z) = 0.5 * tanh(0.5 * z) + 0.5  (1 EUP op + 1 FMA)
    return 0.5 * jnp.tanh(0.5 * z) + 0.5


def lstm_regressor_kernel(x_ref, wih_ref, whh_ref, b_ref, wlin_ref, blin_ref,
                          out_ref, hseq_ref):
    # x_ref:    (T,)       SMEM, input scalars for batch row B-1
    # wih_ref:  (1, 512)   W_ih^T, each gate padded 50 -> 128 lanes
    # whh_ref:  (128, 512) W_hh^T, rows padded 50 -> 128, gates padded
    # b_ref:    (1, 512)   b_ih + b_hh, gate-padded
    # wlin_ref: (128, 128) column 0 = W_lin row (padded), rest zero
    # blin_ref: (1,)       SMEM, Linear bias
    # out_ref:  (T, 128)   lane-dense output; column 0 is the result
    # hseq_ref: (T, 128)   h[B-1] per timestep
    T = hseq_ref.shape[0]

    # Hoisted once (small: 4 + 4 vregs); W_hh stays in VMEM and is streamed to
    # the MXU inside the loop.
    wih = wih_ref[...]                       # (1, 512)
    b = b_ref[...]                           # (1, 512)

    def step(t, carry):
        h, c = carry                         # (1, 128) each, live in vregs
        # Input contribution: scalar-splat FMA, independent of h (off the
        # serial chain, overlaps with the previous step's matmul when unrolled).
        xw = x_ref[t] * wih + b              # (1, 512)
        gates = xw + jnp.dot(h, whh_ref[...],
                             preferred_element_type=jnp.float32)
        # PyTorch gate order i, f, g, o; each gate occupies an aligned 128-lane
        # block, so these slices are free vreg selects.
        i = _sigmoid(gates[:, 0:GP])
        f = _sigmoid(gates[:, GP:2 * GP])
        g = jnp.tanh(gates[:, 2 * GP:3 * GP])
        o = _sigmoid(gates[:, 3 * GP:4 * GP])
        c = f * c + i * g
        h = o * jnp.tanh(c)
        # Only the last batch row feeds the output (x[:, -1, :] in PyTorch).
        hseq_ref[pl.ds(t, 1), :] = h
        return (h, c)

    h0 = jnp.zeros((1, GP), jnp.float32)
    c0 = jnp.zeros((1, GP), jnp.float32)
    # Bounded partial unroll: enough cross-iteration overlap for the scheduler
    # without exploding the instruction footprint at large T.
    lax.fori_loop(0, T, step, (h0, c0), unroll=min(8, max(T, 1)))

    # Final Linear, emitted lane-dense as (T, 128); column 0 carries the value.
    out = jnp.dot(hseq_ref[...], wlin_ref[...],
                  preferred_element_type=jnp.float32) + blin_ref[0]
    out_ref[...] = out


def lstm_regressor(x, w_ih, w_hh, b_ih, b_hh, w_lin, b_lin):
    T, B, _ = x.shape
    H = HIDDEN

    # Pad each gate block of the 4H axis to a 128-lane boundary (padding is
    # exactly zero -- required for the padded-lane invariant).
    def pad_gates_last(w):                      # (..., 4H) -> (..., 4*GP)
        parts = []
        for k in range(4):
            p = w[..., k * H:(k + 1) * H]
            p = jnp.pad(p, [(0, 0)] * (w.ndim - 1) + [(0, GP - H)])
            parts.append(p)
        return jnp.concatenate(parts, axis=-1)

    wih_t = pad_gates_last(w_ih.T).astype(jnp.float32)                  # (1, 512)
    whh_t = jnp.pad(pad_gates_last(w_hh.T),
                    ((0, GP - H), (0, 0))).astype(jnp.float32)          # (128, 512)
    b = pad_gates_last((b_ih + b_hh).reshape(1, 4 * H)).astype(jnp.float32)  # (1, 512)
    wlin_pad = jnp.zeros((GP, GP), jnp.float32).at[:H, 0].set(
        w_lin.reshape(-1).astype(jnp.float32))                          # (128, 128)
    blin = b_lin.reshape(1).astype(jnp.float32)                         # (1,)

    # Only batch row B-1 is ever consumed (x[:, -1, :] on the seq-first output,
    # and LSTM batch rows are independent with zero initial state).
    x_last = x[:, B - 1, 0].astype(jnp.float32)                         # (T,)

    # TODO(synk): for very large T (esp. v7x 64 MiB VMEM), tile T with a grid
    # (T axis 'arbitrary', h/c in persistent scratch) so x/hseq/out are
    # BlockSpec-pipelined instead of fully resident; and if many independent
    # sequences exist, add a leading 'parallel' axis so both v7x TCs are used.
    vmem = pl.BlockSpec(memory_space=pltpu.MemorySpace.VMEM)
    smem = pl.BlockSpec(memory_space=pltpu.MemorySpace.SMEM)
    out = pl.pallas_call(
        lstm_regressor_kernel,
        out_shape=jax.ShapeDtypeStruct((T, GP), jnp.float32),
        in_specs=[smem, vmem, vmem, vmem, vmem, smem],
        out_specs=vmem,
        scratch_shapes=[
            pltpu.VMEM((T, GP), jnp.float32),      # h[B-1] per timestep
        ],
        compiler_params=pltpu.CompilerParams(
            vmem_limit_bytes=32 * 1024 * 1024),
    )(x_last, wih_t, whh_t, b, wlin_pad, blin)

    # x[:, -1, :] -> (T, H); unsqueeze(dim=1) -> (T, 1, H); Linear -> (T, 1, 1)
    return out[:, 0].reshape(T, 1, 1)


def lstm_regressor_ref(x, w_ih, w_hh, b_ih, b_hh, w_lin, b_lin):
    """Pure-JAX reference mirroring the PyTorch forward."""
    T, B, _ = x.shape
    H = HIDDEN
    b = b_ih + b_hh

    def step(carry, x_t):
        h, c = carry
        gates = x_t @ w_ih.T + h @ w_hh.T + b
        i = jax.nn.sigmoid(gates[:, 0:H])
        f = jax.nn.sigmoid(gates[:, H:2 * H])
        g = jnp.tanh(gates[:, 2 * H:3 * H])
        o = jax.nn.sigmoid(gates[:, 3 * H:4 * H])
        c = f * c + i * g
        h = o * jnp.tanh(c)
        return (h, c), h

    h0 = jnp.zeros((B, H), jnp.float32)
    c0 = jnp.zeros((B, H), jnp.float32)
    _, hseq = lax.scan(step, (h0, c0), x)        # (T, B, H)
    last = hseq[:, -1, :]                        # (T, H)
    out = last[:, None, :] @ w_lin.T + b_lin     # (T, 1, 1)
    return out


if __name__ == "__main__":
    T, B, H = 8, 2, HIDDEN
    key = jax.random.PRNGKey(0)
    kx, k1, k2, k3, k4, k5, k6 = jax.random.split(key, 7)

    x = jax.random.normal(kx, (T, B, 1), dtype=jnp.float32)

    # Deterministic param init, PyTorch-style uniform(-1/sqrt(H), 1/sqrt(H))
    s = 1.0 / (H ** 0.5)
    w_ih = jax.random.uniform(k1, (4 * H, 1), jnp.float32, -s, s)
    w_hh = jax.random.uniform(k2, (4 * H, H), jnp.float32, -s, s)
    b_ih = jax.random.uniform(k3, (4 * H,), jnp.float32, -s, s)
    b_hh = jax.random.uniform(k4, (4 * H,), jnp.float32, -s, s)
    sl = 1.0 / (50 ** 0.5)
    w_lin = jax.random.uniform(k5, (1, 50), jnp.float32, -sl, sl)
    b_lin = jax.random.uniform(k6, (1,), jnp.float32, -sl, sl)

    out = lstm_regressor(x, w_ih, w_hh, b_ih, b_hh, w_lin, b_lin)
    out = jax.block_until_ready(out)

    ref = lstm_regressor_ref(x, w_ih, w_hh, b_ih, b_hh, w_lin, b_lin)
    assert out.shape == (T, 1, 1), out.shape
    assert jnp.allclose(out, ref, atol=1e-4, rtol=1e-4), (out, ref)

    print("KERNEL_OK")
</pallas_src>

<mosaic_0001>
module attributes {stable_mosaic.version = 11 : i64} {
  func.func @lstm_regressor_kernel(%arg0: memref<8xf32, #tpu.memory_space<smem>>, %arg1: memref<1x512xf32, #tpu.memory_space<vmem>>, %arg2: memref<128x512xf32, #tpu.memory_space<vmem>>, %arg3: memref<1x512xf32, #tpu.memory_space<vmem>>, %arg4: memref<128x128xf32, #tpu.memory_space<vmem>>, %arg5: memref<1xf32, #tpu.memory_space<smem>>, %arg6: memref<8x128xf32, #tpu.memory_space<vmem>>, %arg7: memref<8x128xf32, #tpu.memory_space<vmem>>) attributes {dimension_semantics = [], scalar_prefetch = 0 : i64, scratch_operands = 1 : i64, tpu.core_type = #tpu.core_type<tc>} {
    %c0 = arith.constant 0 : index
    %c0_0 = arith.constant 0 : index
    %0 = vector.load %arg1[%c0, %c0_0] : memref<1x512xf32, #tpu.memory_space<vmem>>, vector<1x512xf32>
    %c0_1 = arith.constant 0 : index
    %c0_2 = arith.constant 0 : index
    %1 = vector.load %arg3[%c0_1, %c0_2] : memref<1x512xf32, #tpu.memory_space<vmem>>, vector<1x512xf32>
    %cst = arith.constant 0.000000e+00 : f32
    %2 = vector.broadcast %cst : f32 to vector<1x128xf32>
    %cst_3 = arith.constant 0.000000e+00 : f32
    %3 = vector.broadcast %cst_3 : f32 to vector<1x128xf32>
    %c0_i32 = arith.constant 0 : i32
    %4 = arith.index_cast %c0_i32 : i32 to index
    %5 = memref.load %arg0[%4] : memref<8xf32, #tpu.memory_space<smem>>
    %6 = vector.broadcast %5 : f32 to vector<1x512xf32>
    %7 = arith.mulf %6, %0 : vector<1x512xf32>
    %8 = arith.addf %7, %1 : vector<1x512xf32>
    %c0_4 = arith.constant 0 : index
    %c0_5 = arith.constant 0 : index
    %9 = vector.load %arg2[%c0_4, %c0_5] : memref<128x512xf32, #tpu.memory_space<vmem>>, vector<128x512xf32>
    %cst_6 = arith.constant dense<0.000000e+00> : vector<1x512xf32>
    %10 = tpu.matmul %2, %9, %cst_6 {dimension_numbers = #tpu.dot_dimension_numbers<[1], [0], [0], [1], [0, 0, 1, 1], [], []>} : vector<1x128xf32>, vector<128x512xf32>, vector<1x512xf32> -> vector<1x512xf32>
    %11 = arith.addf %8, %10 : vector<1x512xf32>
    %12 = vector.extract_strided_slice %11 {offsets = [0, 0], sizes = [1, 128], strides = [1, 1]} : vector<1x512xf32> to vector<1x128xf32>
    %cst_7 = arith.constant 5.000000e-01 : f32
    %13 = vector.broadcast %cst_7 : f32 to vector<1x128xf32>
    %14 = arith.mulf %13, %12 : vector<1x128xf32>
    %15 = math.tanh %14 : vector<1x128xf32>
    %cst_8 = arith.constant 5.000000e-01 : f32
    %16 = vector.broadcast %cst_8 : f32 to vector<1x128xf32>
    %17 = arith.mulf %16, %15 : vector<1x128xf32>
    %cst_9 = arith.constant 5.000000e-01 : f32
    %18 = vector.broadcast %cst_9 : f32 to vector<1x128xf32>
    %19 = arith.addf %17, %18 : vector<1x128xf32>
    %20 = vector.extract_strided_slice %11 {offsets = [0, 128], sizes = [1, 128], strides = [1, 1]} : vector<1x512xf32> to vector<1x128xf32>
    %cst_10 = arith.constant 5.000000e-01 : f32
    %21 = vector.broadcast %cst_10 : f32 to vector<1x128xf32>
    %22 = arith.mulf %21, %20 : vector<1x128xf32>
    %23 = math.tanh %22 : vector<1x128xf32>
    %cst_11 = arith.constant 5.000000e-01 : f32
    %24 = vector.broadcast %cst_11 : f32 to vector<1x128xf32>
    %25 = arith.mulf %24, %23 : vector<1x128xf32>
    %cst_12 = arith.constant 5.000000e-01 : f32
    %26 = vector.broadcast %cst_12 : f32 to vector<1x128xf32>
    %27 = arith.addf %25, %26 : vector<1x128xf32>
    %28 = vector.extract_strided_slice %11 {offsets = [0, 256], sizes = [1, 128], strides = [1, 1]} : vector<1x512xf32> to vector<1x128xf32>
    %29 = math.tanh %28 : vector<1x128xf32>
    %30 = vector.extract_strided_slice %11 {offsets = [0, 384], sizes = [1, 128], strides = [1, 1]} : vector<1x512xf32> to vector<1x128xf32>
    %cst_13 = arith.constant 5.000000e-01 : f32
    %31 = vector.broadcast %cst_13 : f32 to vector<1x128xf32>
    %32 = arith.mulf %31, %30 : vector<1x128xf32>
    %33 = math.tanh %32 : vector<1x128xf32>
    %cst_14 = arith.constant 5.000000e-01 : f32
    %34 = vector.broadcast %cst_14 : f32 to vector<1x128xf32>
    %35 = arith.mulf %34, %33 : vector<1x128xf32>
    %cst_15 = arith.constant 5.000000e-01 : f32
    %36 = vector.broadcast %cst_15 : f32 to vector<1x128xf32>
    %37 = arith.addf %35, %36 : vector<1x128xf32>
    %38 = arith.mulf %27, %3 : vector<1x128xf32>
    %39 = arith.mulf %19, %29 : vector<1x128xf32>
    %40 = arith.addf %38, %39 : vector<1x128xf32>
    %41 = math.tanh %40 : vector<1x128xf32>
    %42 = arith.mulf %37, %41 : vector<1x128xf32>
    %43 = arith.index_cast %c0_i32 : i32 to index
    %c0_16 = arith.constant 0 : index
    %44 = vector.load %arg7[%43, %c0_16] : memref<8x128xf32, #tpu.memory_space<vmem>>, vector<1x128xf32>
    tpu.vector_store %arg7[%43, %c0_16], %42 {strides = array<i32>} : memref<8x128xf32, #tpu.memory_space<vmem>>, vector<1x128xf32>,
    %c1_i32 = arith.constant 1 : i32
    %45 = arith.index_cast %c1_i32 : i32 to index
    %46 = memref.load %arg0[%45] : memref<8xf32, #tpu.memory_space<smem>>
    %47 = vector.broadcast %46 : f32 to vector<1x512xf32>
    %48 = arith.mulf %47, %0 : vector<1x512xf32>
    %49 = arith.addf %48, %1 : vector<1x512xf32>
    %c0_17 = arith.constant 0 : index
    %c0_18 = arith.constant 0 : index
    %50 = vector.load %arg2[%c0_17, %c0_18] : memref<128x512xf32, #tpu.memory_space<vmem>>, vector<128x512xf32>
    %cst_19 = arith.constant dense<0.000000e+00> : vector<1x512xf32>
    %51 = tpu.matmul %42, %50, %cst_19 {dimension_numbers = #tpu.dot_dimension_numbers<[1], [0], [0], [1], [0, 0, 1, 1], [], []>} : vector<1x128xf32>, vector<128x512xf32>, vector<1x512xf32> -> vector<1x512xf32>
    %52 = arith.addf %49, %51 : vector<1x512xf32>
    %53 = vector.extract_strided_slice %52 {offsets = [0, 0], sizes = [1, 128], strides = [1, 1]} : vector<1x512xf32> to vector<1x128xf32>
    %cst_20 = arith.constant 5.000000e-01 : f32
    %54 = vector.broadcast %cst_20 : f32 to vector<1x128xf32>
    %55 = arith.mulf %54, %53 : vector<1x128xf32>
    %56 = math.tanh %55 : vector<1x128xf32>
    %cst_21 = arith.constant 5.000000e-01 : f32
    %57 = vector.broadcast %cst_21 : f32 to vector<1x128xf32>
    %58 = arith.mulf %57, %56 : vector<1x128xf32>
    %cst_22 = arith.constant 5.000000e-01 : f32
    %59 = vector.broadcast %cst_22 : f32 to vector<1x128xf32>
    %60 = arith.addf %58, %59 : vector<1x128xf32>
    %61 = vector.extract_strided_slice %52 {offsets = [0, 128], sizes = [1, 128], strides = [1, 1]} : vector<1x512xf32> to vector<1x128xf32>
    %cst_23 = arith.constant 5.000000e-01 : f32
    %62 = vector.broadcast %cst_23 : f32 to vector<1x128xf32>
    %63 = arith.mulf %62, %61 : vector<1x128xf32>
    %64 = math.tanh %63 : vector<1x128xf32>
    %cst_24 = arith.constant 5.000000e-01 : f32
    %65 = vector.broadcast %cst_24 : f32 to vector<1x128xf32>
    %66 = arith.mulf %65, %64 : vector<1x128xf32>
    %cst_25 = arith.constant 5.000000e-01 : f32
    %67 = vector.broadcast %cst_25 : f32 to vector<1x128xf32>
    %68 = arith.addf %66, %67 : vector<1x128xf32>
    %69 = vector.extract_strided_slice %52 {offsets = [0, 256], sizes = [1, 128], strides = [1, 1]} : vector<1x512xf32> to vector<1x128xf32>
    %70 = math.tanh %69 : vector<1x128xf32>
    %71 = vector.extract_strided_slice %52 {offsets = [0, 384], sizes = [1, 128], strides = [1, 1]} : vector<1x512xf32> to vector<1x128xf32>
    %cst_26 = arith.constant 5.000000e-01 : f32
    %72 = vector.broadcast %cst_26 : f32 to vector<1x128xf32>
    %73 = arith.mulf %72, %71 : vector<1x128xf32>
    %74 = math.tanh %73 : vector<1x128xf32>
    %cst_27 = arith.constant 5.000000e-01 : f32
    %75 = vector.broadcast %cst_27 : f32 to vector<1x128xf32>
    %76 = arith.mulf %75, %74 : vector<1x128xf32>
    %cst_28 = arith.constant 5.000000e-01 : f32
    %77 = vector.broadcast %cst_28 : f32 to vector<1x128xf32>
    %78 = arith.addf %76, %77 : vector<1x128xf32>
    %79 = arith.mulf %68, %40 : vector<1x128xf32>
    %80 = arith.mulf %60, %70 : vector<1x128xf32>
    %81 = arith.addf %79, %80 : vector<1x128xf32>
    %82 = math.tanh %81 : vector<1x128xf32>
    %83 = arith.mulf %78, %82 : vector<1x128xf32>
    %84 = arith.index_cast %c1_i32 : i32 to index
    %c0_29 = arith.constant 0 : index
    %85 = vector.load %arg7[%84, %c0_29] : memref<8x128xf32, #tpu.memory_space<vmem>>, vector<1x128xf32>
    tpu.vector_store %arg7[%84, %c0_29], %83 {strides = array<i32>} : memref<8x128xf32, #tpu.memory_space<vmem>>, vector<1x128xf32>,
    %c2_i32 = arith.constant 2 : i32
    %86 = arith.index_cast %c2_i32 : i32 to index
    %87 = memref.load %arg0[%86] : memref<8xf32, #tpu.memory_space<smem>>
    %88 = vector.broadcast %87 : f32 to vector<1x512xf32>
    %89 = arith.mulf %88, %0 : vector<1x512xf32>
    %90 = arith.addf %89, %1 : vector<1x512xf32>
    %c0_30 = arith.constant 0 : index
    %c0_31 = arith.constant 0 : index
    %91 = vector.load %arg2[%c0_30, %c0_31] : memref<128x512xf32, #tpu.memory_space<vmem>>, vector<128x512xf32>
    %cst_32 = arith.constant dense<0.000000e+00> : vector<1x512xf32>
    %92 = tpu.matmul %83, %91, %cst_32 {dimension_numbers = #tpu.dot_dimension_numbers<[1], [0], [0], [1], [0, 0, 1, 1], [], []>} : vector<1x128xf32>, vector<128x512xf32>, vector<1x512xf32> -> vector<1x512xf32>
    %93 = arith.addf %90, %92 : vector<1x512xf32>
    %94 = vector.extract_strided_slice %93 {offsets = [0, 0], sizes = [1, 128], strides = [1, 1]} : vector<1x512xf32> to vector<1x128xf32>
    %cst_33 = arith.constant 5.000000e-01 : f32
    %95 = vector.broadcast %cst_33 : f32 to vector<1x128xf32>
    %96 = arith.mulf %95, %94 : vector<1x128xf32>
    %97 = math.tanh %96 : vector<1x128xf32>
    %cst_34 = arith.constant 5.000000e-01 : f32
    %98 = vector.broadcast %cst_34 : f32 to vector<1x128xf32>
    %99 = arith.mulf %98, %97 : vector<1x128xf32>
    %cst_35 = arith.constant 5.000000e-01 : f32
    %100 = vector.broadcast %cst_35 : f32 to vector<1x128xf32>
    %101 = arith.addf %99, %100 : vector<1x128xf32>
    %102 = vector.extract_strided_slice %93 {offsets = [0, 128], sizes = [1, 128], strides = [1, 1]} : vector<1x512xf32> to vector<1x128xf32>
    %cst_36 = arith.constant 5.000000e-01 : f32
    %103 = vector.broadcast %cst_36 : f32 to vector<1x128xf32>
    %104 = arith.mulf %103, %102 : vector<1x128xf32>
    %105 = math.tanh %104 : vector<1x128xf32>
    %cst_37 = arith.constant 5.000000e-01 : f32
    %106 = vector.broadcast %cst_37 : f32 to vector<1x128xf32>
    %107 = arith.mulf %106, %105 : vector<1x128xf32>
    %cst_38 = arith.constant 5.000000e-01 : f32
    %108 = vector.broadcast %cst_38 : f32 to vector<1x128xf32>
    %109 = arith.addf %107, %108 : vector<1x128xf32>
    %110 = vector.extract_strided_slice %93 {offsets = [0, 256], sizes = [1, 128], strides = [1, 1]} : vector<1x512xf32> to vector<1x128xf32>
    %111 = math.tanh %110 : vector<1x128xf32>
    %112 = vector.extract_strided_slice %93 {offsets = [0, 384], sizes = [1, 128], strides = [1, 1]} : vector<1x512xf32> to vector<1x128xf32>
    %cst_39 = arith.constant 5.000000e-01 : f32
    %113 = vector.broadcast %cst_39 : f32 to vector<1x128xf32>
    %114 = arith.mulf %113, %112 : vector<1x128xf32>
    %115 = math.tanh %114 : vector<1x128xf32>
    %cst_40 = arith.constant 5.000000e-01 : f32
    %116 = vector.broadcast %cst_40 : f32 to vector<1x128xf32>
    %117 = arith.mulf %116, %115 : vector<1x128xf32>
    %cst_41 = arith.constant 5.000000e-01 : f32
    %118 = vector.broadcast %cst_41 : f32 to vector<1x128xf32>
    %119 = arith.addf %117, %118 : vector<1x128xf32>
    %120 = arith.mulf %109, %81 : vector<1x128xf32>
    %121 = arith.mulf %101, %111 : vector<1x128xf32>
    %122 = arith.addf %120, %121 : vector<1x128xf32>
    %123 = math.tanh %122 : vector<1x128xf32>
    %124 = arith.mulf %119, %123 : vector<1x128xf32>
    %125 = arith.index_cast %c2_i32 : i32 to index
    %c0_42 = arith.constant 0 : index
    %126 = vector.load %arg7[%125, %c0_42] : memref<8x128xf32, #tpu.memory_space<vmem>>, vector<1x128xf32>
    tpu.vector_store %arg7[%125, %c0_42], %124 {strides = array<i32>} : memref<8x128xf32, #tpu.memory_space<vmem>>, vector<1x128xf32>,
    %c3_i32 = arith.constant 3 : i32
    %127 = arith.index_cast %c3_i32 : i32 to index
    %128 = memref.load %arg0[%127] : memref<8xf32, #tpu.memory_space<smem>>
    %129 = vector.broadcast %128 : f32 to vector<1x512xf32>
    %130 = arith.mulf %129, %0 : vector<1x512xf32>
    %131 = arith.addf %130, %1 : vector<1x512xf32>
    %c0_43 = arith.constant 0 : index
    %c0_44 = arith.constant 0 : index
    %132 = vector.load %arg2[%c0_43, %c0_44] : memref<128x512xf32, #tpu.memory_space<vmem>>, vector<128x512xf32>
    %cst_45 = arith.constant dense<0.000000e+00> : vector<1x512xf32>
    %133 = tpu.matmul %124, %132, %cst_45 {dimension_numbers = #tpu.dot_dimension_numbers<[1], [0], [0], [1], [0, 0, 1, 1], [], []>} : vector<1x128xf32>, vector<128x512xf32>, vector<1x512xf32> -> vector<1x512xf32>
    %134 = arith.addf %131, %133 : vector<1x512xf32>
    %135 = vector.extract_strided_slice %134 {offsets = [0, 0], sizes = [1, 128], strides = [1, 1]} : vector<1x512xf32> to vector<1x128xf32>
    %cst_46 = arith.constant 5.000000e-01 : f32
    %136 = vector.broadcast %cst_46 : f32 to vector<1x128xf32>
    %137 = arith.mulf %136, %135 : vector<1x128xf32>
    %138 = math.tanh %137 : vector<1x128xf32>
    %cst_47 = arith.constant 5.000000e-01 : f32
    %139 = vector.broadcast %cst_47 : f32 to vector<1x128xf32>
    %140 = arith.mulf %139, %138 : vector<1x128xf32>
    %cst_48 = arith.constant 5.000000e-01 : f32
    %141 = vector.broadcast %cst_48 : f32 to vector<1x128xf32>
    %142 = arith.addf %140, %141 : vector<1x128xf32>
    %143 = vector.extract_strided_slice %134 {offsets = [0, 128], sizes = [1, 128], strides = [1, 1]} : vector<1x512xf32> to vector<1x128xf32>
    %cst_49 = arith.constant 5.000000e-01 : f32
    %144 = vector.broadcast %cst_49 : f32 to vector<1x128xf32>
    %145 = arith.mulf %144, %143 : vector<1x128xf32>
    %146 = math.tanh %145 : vector<1x128xf32>
    %cst_50 = arith.constant 5.000000e-01 : f32
    %147 = vector.broadcast %cst_50 : f32 to vector<1x128xf32>
    %148 = arith.mulf %147, %146 : vector<1x128xf32>
    %cst_51 = arith.constant 5.000000e-01 : f32
    %149 = vector.broadcast %cst_51 : f32 to vector<1x128xf32>
    %150 = arith.addf %148, %149 : vector<1x128xf32>
    %151 = vector.extract_strided_slice %134 {offsets = [0, 256], sizes = [1, 128], strides = [1, 1]} : vector<1x512xf32> to vector<1x128xf32>
    %152 = math.tanh %151 : vector<1x128xf32>
    %153 = vector.extract_strided_slice %134 {offsets = [0, 384], sizes = [1, 128], strides = [1, 1]} : vector<1x512xf32> to vector<1x128xf32>
    %cst_52 = arith.constant 5.000000e-01 : f32
    %154 = vector.broadcast %cst_52 : f32 to vector<1x128xf32>
    %155 = arith.mulf %154, %153 : vector<1x128xf32>
    %156 = math.tanh %155 : vector<1x128xf32>
    %cst_53 = arith.constant 5.000000e-01 : f32
    %157 = vector.broadcast %cst_53 : f32 to vector<1x128xf32>
    %158 = arith.mulf %157, %156 : vector<1x128xf32>
    %cst_54 = arith.constant 5.000000e-01 : f32
    %159 = vector.broadcast %cst_54 : f32 to vector<1x128xf32>
    %160 = arith.addf %158, %159 : vector<1x128xf32>
    %161 = arith.mulf %150, %122 : vector<1x128xf32>
    %162 = arith.mulf %142, %152 : vector<1x128xf32>
    %163 = arith.addf %161, %162 : vector<1x128xf32>
    %164 = math.tanh %163 : vector<1x128xf32>
    %165 = arith.mulf %160, %164 : vector<1x128xf32>
    %166 = arith.index_cast %c3_i32 : i32 to index
    %c0_55 = arith.constant 0 : index
    %167 = vector.load %arg7[%166, %c0_55] : memref<8x128xf32, #tpu.memory_space<vmem>>, vector<1x128xf32>
    tpu.vector_store %arg7[%166, %c0_55], %165 {strides = array<i32>} : memref<8x128xf32, #tpu.memory_space<vmem>>, vector<1x128xf32>,
    %c4_i32 = arith.constant 4 : i32
    %168 = arith.index_cast %c4_i32 : i32 to index
    %169 = memref.load %arg0[%168] : memref<8xf32, #tpu.memory_space<smem>>
    %170 = vector.broadcast %169 : f32 to vector<1x512xf32>
    %171 = arith.mulf %170, %0 : vector<1x512xf32>
    %172 = arith.addf %171, %1 : vector<1x512xf32>
    %c0_56 = arith.constant 0 : index
    %c0_57 = arith.constant 0 : index
    %173 = vector.load %arg2[%c0_56, %c0_57] : memref<128x512xf32, #tpu.memory_space<vmem>>, vector<128x512xf32>
    %cst_58 = arith.constant dense<0.000000e+00> : vector<1x512xf32>
    %174 = tpu.matmul %165, %173, %cst_58 {dimension_numbers = #tpu.dot_dimension_numbers<[1], [0], [0], [1], [0, 0, 1, 1], [], []>} : vector<1x128xf32>, vector<128x512xf32>, vector<1x512xf32> -> vector<1x512xf32>
    %175 = arith.addf %172, %174 : vector<1x512xf32>
    %176 = vector.extract_strided_slice %175 {offsets = [0, 0], sizes = [1, 128], strides = [1, 1]} : vector<1x512xf32> to vector<1x128xf32>
    %cst_59 = arith.constant 5.000000e-01 : f32
    %177 = vector.broadcast %cst_59 : f32 to vector<1x128xf32>
    %178 = arith.mulf %177, %176 : vector<1x128xf32>
    %179 = math.tanh %178 : vector<1x128xf32>
    %cst_60 = arith.constant 5.000000e-01 : f32
    %180 = vector.broadcast %cst_60 : f32 to vector<1x128xf32>
    %181 = arith.mulf %180, %179 : vector<1x128xf32>
    %cst_61 = arith.constant 5.000000e-01 : f32
    %182 = vector.broadcast %cst_61 : f32 to vector<1x128xf32>
    %183 = arith.addf %181, %182 : vector<1x128xf32>
    %184 = vector.extract_strided_slice %175 {offsets = [0, 128], sizes = [1, 128], strides = [1, 1]} : vector<1x512xf32> to vector<1x128xf32>
    %cst_62 = arith.constant 5.000000e-01 : f32
    %185 = vector.broadcast %cst_62 : f32 to vector<1x128xf32>
    %186 = arith.mulf %185, %184 : vector<1x128xf32>
    %187 = math.tanh %186 : vector<1x128xf32>
    %cst_63 = arith.constant 5.000000e-01 : f32
    %188 = vector.broadcast %cst_63 : f32 to vector<1x128xf32>
    %189 = arith.mulf %188, %187 : vector<1x128xf32>
    %cst_64 = arith.constant 5.000000e-01 : f32
    %190 = vector.broadcast %cst_64 : f32 to vector<1x128xf32>
    %191 = arith.addf %189, %190 : vector<1x128xf32>
    %192 = vector.extract_strided_slice %175 {offsets = [0, 256], sizes = [1, 128], strides = [1, 1]} : vector<1x512xf32> to vector<1x128xf32>
    %193 = math.tanh %192 : vector<1x128xf32>
    %194 = vector.extract_strided_slice %175 {offsets = [0, 384], sizes = [1, 128], strides = [1, 1]} : vector<1x512xf32> to vector<1x128xf32>
    %cst_65 = arith.constant 5.000000e-01 : f32
    %195 = vector.broadcast %cst_65 : f32 to vector<1x128xf32>
    %196 = arith.mulf %195, %194 : vector<1x128xf32>
    %197 = math.tanh %196 : vector<1x128xf32>
    %cst_66 = arith.constant 5.000000e-01 : f32
    %198 = vector.broadcast %cst_66 : f32 to vector<1x128xf32>
    %199 = arith.mulf %198, %197 : vector<1x128xf32>
    %cst_67 = arith.constant 5.000000e-01 : f32
    %200 = vector.broadcast %cst_67 : f32 to vector<1x128xf32>
    %201 = arith.addf %199, %200 : vector<1x128xf32>
    %202 = arith.mulf %191, %163 : vector<1x128xf32>
    %203 = arith.mulf %183, %193 : vector<1x128xf32>
    %204 = arith.addf %202, %203 : vector<1x128xf32>
    %205 = math.tanh %204 : vector<1x128xf32>
    %206 = arith.mulf %201, %205 : vector<1x128xf32>
    %207 = arith.index_cast %c4_i32 : i32 to index
    %c0_68 = arith.constant 0 : index
    %208 = vector.load %arg7[%207, %c0_68] : memref<8x128xf32, #tpu.memory_space<vmem>>, vector<1x128xf32>
    tpu.vector_store %arg7[%207, %c0_68], %206 {strides = array<i32>} : memref<8x128xf32, #tpu.memory_space<vmem>>, vector<1x128xf32>,
    %c5_i32 = arith.constant 5 : i32
    %209 = arith.index_cast %c5_i32 : i32 to index
    %210 = memref.load %arg0[%209] : memref<8xf32, #tpu.memory_space<smem>>
    %211 = vector.broadcast %210 : f32 to vector<1x512xf32>
    %212 = arith.mulf %211, %0 : vector<1x512xf32>
    %213 = arith.addf %212, %1 : vector<1x512xf32>
    %c0_69 = arith.constant 0 : index
    %c0_70 = arith.constant 0 : index
    %214 = vector.load %arg2[%c0_69, %c0_70] : memref<128x512xf32, #tpu.memory_space<vmem>>, vector<128x512xf32>
    %cst_71 = arith.constant dense<0.000000e+00> : vector<1x512xf32>
    %215 = tpu.matmul %206, %214, %cst_71 {dimension_numbers = #tpu.dot_dimension_numbers<[1], [0], [0], [1], [0, 0, 1, 1], [], []>} : vector<1x128xf32>, vector<128x512xf32>, vector<1x512xf32> -> vector<1x512xf32>
    %216 = arith.addf %213, %215 : vector<1x512xf32>
    %217 = vector.extract_strided_slice %216 {offsets = [0, 0], sizes = [1, 128], strides = [1, 1]} : vector<1x512xf32> to vector<1x128xf32>
    %cst_72 = arith.constant 5.000000e-01 : f32
    %218 = vector.broadcast %cst_72 : f32 to vector<1x128xf32>
    %219 = arith.mulf %218, %217 : vector<1x128xf32>
    %220 = math.tanh %219 : vector<1x128xf32>
    %cst_73 = arith.constant 5.000000e-01 : f32
    %221 = vector.broadcast %cst_73 : f32 to vector<1x128xf32>
    %222 = arith.mulf %221, %220 : vector<1x128xf32>
    %cst_74 = arith.constant 5.000000e-01 : f32
    %223 = vector.broadcast %cst_74 : f32 to vector<1x128xf32>
    %224 = arith.addf %222, %223 : vector<1x128xf32>
    %225 = vector.extract_strided_slice %216 {offsets = [0, 128], sizes = [1, 128], strides = [1, 1]} : vector<1x512xf32> to vector<1x128xf32>
    %cst_75 = arith.constant 5.000000e-01 : f32
    %226 = vector.broadcast %cst_75 : f32 to vector<1x128xf32>
    %227 = arith.mulf %226, %225 : vector<1x128xf32>
    %228 = math.tanh %227 : vector<1x128xf32>
    %cst_76 = arith.constant 5.000000e-01 : f32
    %229 = vector.broadcast %cst_76 : f32 to vector<1x128xf32>
    %230 = arith.mulf %229, %228 : vector<1x128xf32>
    %cst_77 = arith.constant 5.000000e-01 : f32
    %231 = vector.broadcast %cst_77 : f32 to vector<1x128xf32>
    %232 = arith.addf %230, %231 : vector<1x128xf32>
    %233 = vector.extract_strided_slice %216 {offsets = [0, 256], sizes = [1, 128], strides = [1, 1]} : vector<1x512xf32> to vector<1x128xf32>
    %234 = math.tanh %233 : vector<1x128xf32>
    %235 = vector.extract_strided_slice %216 {offsets = [0, 384], sizes = [1, 128], strides = [1, 1]} : vector<1x512xf32> to vector<1x128xf32>
    %cst_78 = arith.constant 5.000000e-01 : f32
    %236 = vector.broadcast %cst_78 : f32 to vector<1x128xf32>
    %237 = arith.mulf %236, %235 : vector<1x128xf32>
    %238 = math.tanh %237 : vector<1x128xf32>
    %cst_79 = arith.constant 5.000000e-01 : f32
    %239 = vector.broadcast %cst_79 : f32 to vector<1x128xf32>
    %240 = arith.mulf %239, %238 : vector<1x128xf32>
    %cst_80 = arith.constant 5.000000e-01 : f32
    %241 = vector.broadcast %cst_80 : f32 to vector<1x128xf32>
    %242 = arith.addf %240, %241 : vector<1x128xf32>
    %243 = arith.mulf %232, %204 : vector<1x128xf32>
    %244 = arith.mulf %224, %234 : vector<1x128xf32>
    %245 = arith.addf %243, %244 : vector<1x128xf32>
    %246 = math.tanh %245 : vector<1x128xf32>
    %247 = arith.mulf %242, %246 : vector<1x128xf32>
    %248 = arith.index_cast %c5_i32 : i32 to index
    %c0_81 = arith.constant 0 : index
    %249 = vector.load %arg7[%248, %c0_81] : memref<8x128xf32, #tpu.memory_space<vmem>>, vector<1x128xf32>
    tpu.vector_store %arg7[%248, %c0_81], %247 {strides = array<i32>} : memref<8x128xf32, #tpu.memory_space<vmem>>, vector<1x128xf32>,
    %c6_i32 = arith.constant 6 : i32
    %250 = arith.index_cast %c6_i32 : i32 to index
    %251 = memref.load %arg0[%250] : memref<8xf32, #tpu.memory_space<smem>>
    %252 = vector.broadcast %251 : f32 to vector<1x512xf32>
    %253 = arith.mulf %252, %0 : vector<1x512xf32>
    %254 = arith.addf %253, %1 : vector<1x512xf32>
    %c0_82 = arith.constant 0 : index
    %c0_83 = arith.constant 0 : index
    %255 = vector.load %arg2[%c0_82, %c0_83] : memref<128x512xf32, #tpu.memory_space<vmem>>, vector<128x512xf32>
    %cst_84 = arith.constant dense<0.000000e+00> : vector<1x512xf32>
    %256 = tpu.matmul %247, %255, %cst_84 {dimension_numbers = #tpu.dot_dimension_numbers<[1], [0], [0], [1], [0, 0, 1, 1], [], []>} : vector<1x128xf32>, vector<128x512xf32>, vector<1x512xf32> -> vector<1x512xf32>
    %257 = arith.addf %254, %256 : vector<1x512xf32>
    %258 = vector.extract_strided_slice %257 {offsets = [0, 0], sizes = [1, 128], strides = [1, 1]} : vector<1x512xf32> to vector<1x128xf32>
    %cst_85 = arith.constant 5.000000e-01 : f32
    %259 = vector.broadcast %cst_85 : f32 to vector<1x128xf32>
    %260 = arith.mulf %259, %258 : vector<1x128xf32>
    %261 = math.tanh %260 : vector<1x128xf32>
    %cst_86 = arith.constant 5.000000e-01 : f32
    %262 = vector.broadcast %cst_86 : f32 to vector<1x128xf32>
    %263 = arith.mulf %262, %261 : vector<1x128xf32>
    %cst_87 = arith.constant 5.000000e-01 : f32
    %264 = vector.broadcast %cst_87 : f32 to vector<1x128xf32>
    %265 = arith.addf %263, %264 : vector<1x128xf32>
    %266 = vector.extract_strided_slice %257 {offsets = [0, 128], sizes = [1, 128], strides = [1, 1]} : vector<1x512xf32> to vector<1x128xf32>
    %cst_88 = arith.constant 5.000000e-01 : f32
    %267 = vector.broadcast %cst_88 : f32 to vector<1x128xf32>
    %268 = arith.mulf %267, %266 : vector<1x128xf32>
    %269 = math.tanh %268 : vector<1x128xf32>
    %cst_89 = arith.constant 5.000000e-01 : f32
    %270 = vector.broadcast %cst_89 : f32 to vector<1x128xf32>
    %271 = arith.mulf %270, %269 : vector<1x128xf32>
    %cst_90 = arith.constant 5.000000e-01 : f32
    %272 = vector.broadcast %cst_90 : f32 to vector<1x128xf32>
    %273 = arith.addf %271, %272 : vector<1x128xf32>
    %274 = vector.extract_strided_slice %257 {offsets = [0, 256], sizes = [1, 128], strides = [1, 1]} : vector<1x512xf32> to vector<1x128xf32>
    %275 = math.tanh %274 : vector<1x128xf32>
    %276 = vector.extract_strided_slice %257 {offsets = [0, 384], sizes = [1, 128], strides = [1, 1]} : vector<1x512xf32> to vector<1x128xf32>
    %cst_91 = arith.constant 5.000000e-01 : f32
    %277 = vector.broadcast %cst_91 : f32 to vector<1x128xf32>
    %278 = arith.mulf %277, %276 : vector<1x128xf32>
    %279 = math.tanh %278 : vector<1x128xf32>
    %cst_92 = arith.constant 5.000000e-01 : f32
    %280 = vector.broadcast %cst_92 : f32 to vector<1x128xf32>
    %281 = arith.mulf %280, %279 : vector<1x128xf32>
    %cst_93 = arith.constant 5.000000e-01 : f32
    %282 = vector.broadcast %cst_93 : f32 to vector<1x128xf32>
    %283 = arith.addf %281, %282 : vector<1x128xf32>
    %284 = arith.mulf %273, %245 : vector<1x128xf32>
    %285 = arith.mulf %265, %275 : vector<1x128xf32>
    %286 = arith.addf %284, %285 : vector<1x128xf32>
    %287 = math.tanh %286 : vector<1x128xf32>
    %288 = arith.mulf %283, %287 : vector<1x128xf32>
    %289 = arith.index_cast %c6_i32 : i32 to index
    %c0_94 = arith.constant 0 : index
    %290 = vector.load %arg7[%289, %c0_94] : memref<8x128xf32, #tpu.memory_space<vmem>>, vector<1x128xf32>
    tpu.vector_store %arg7[%289, %c0_94], %288 {strides = array<i32>} : memref<8x128xf32, #tpu.memory_space<vmem>>, vector<1x128xf32>,
    %c7_i32 = arith.constant 7 : i32
    %291 = arith.index_cast %c7_i32 : i32 to index
    %292 = memref.load %arg0[%291] : memref<8xf32, #tpu.memory_space<smem>>
    %293 = vector.broadcast %292 : f32 to vector<1x512xf32>
    %294 = arith.mulf %293, %0 : vector<1x512xf32>
    %295 = arith.addf %294, %1 : vector<1x512xf32>
    %c0_95 = arith.constant 0 : index
    %c0_96 = arith.constant 0 : index
    %296 = vector.load %arg2[%c0_95, %c0_96] : memref<128x512xf32, #tpu.memory_space<vmem>>, vector<128x512xf32>
    %cst_97 = arith.constant dense<0.000000e+00> : vector<1x512xf32>
    %297 = tpu.matmul %288, %296, %cst_97 {dimension_numbers = #tpu.dot_dimension_numbers<[1], [0], [0], [1], [0, 0, 1, 1], [], []>} : vector<1x128xf32>, vector<128x512xf32>, vector<1x512xf32> -> vector<1x512xf32>
    %298 = arith.addf %295, %297 : vector<1x512xf32>
    %299 = vector.extract_strided_slice %298 {offsets = [0, 0], sizes = [1, 128], strides = [1, 1]} : vector<1x512xf32> to vector<1x128xf32>
    %cst_98 = arith.constant 5.000000e-01 : f32
    %300 = vector.broadcast %cst_98 : f32 to vector<1x128xf32>
    %301 = arith.mulf %300, %299 : vector<1x128xf32>
    %302 = math.tanh %301 : vector<1x128xf32>
    %cst_99 = arith.constant 5.000000e-01 : f32
    %303 = vector.broadcast %cst_99 : f32 to vector<1x128xf32>
    %304 = arith.mulf %303, %302 : vector<1x128xf32>
    %cst_100 = arith.constant 5.000000e-01 : f32
    %305 = vector.broadcast %cst_100 : f32 to vector<1x128xf32>
    %306 = arith.addf %304, %305 : vector<1x128xf32>
    %307 = vector.extract_strided_slice %298 {offsets = [0, 128], sizes = [1, 128], strides = [1, 1]} : vector<1x512xf32> to vector<1x128xf32>
    %cst_101 = arith.constant 5.000000e-01 : f32
    %308 = vector.broadcast %cst_101 : f32 to vector<1x128xf32>
    %309 = arith.mulf %308, %307 : vector<1x128xf32>
    %310 = math.tanh %309 : vector<1x128xf32>
    %cst_102 = arith.constant 5.000000e-01 : f32
    %311 = vector.broadcast %cst_102 : f32 to vector<1x128xf32>
    %312 = arith.mulf %311, %310 : vector<1x128xf32>
    %cst_103 = arith.constant 5.000000e-01 : f32
    %313 = vector.broadcast %cst_103 : f32 to vector<1x128xf32>
    %314 = arith.addf %312, %313 : vector<1x128xf32>
    %315 = vector.extract_strided_slice %298 {offsets = [0, 256], sizes = [1, 128], strides = [1, 1]} : vector<1x512xf32> to vector<1x128xf32>
    %316 = math.tanh %315 : vector<1x128xf32>
    %317 = vector.extract_strided_slice %298 {offsets = [0, 384], sizes = [1, 128], strides = [1, 1]} : vector<1x512xf32> to vector<1x128xf32>
    %cst_104 = arith.constant 5.000000e-01 : f32
    %318 = vector.broadcast %cst_104 : f32 to vector<1x128xf32>
    %319 = arith.mulf %318, %317 : vector<1x128xf32>
    %320 = math.tanh %319 : vector<1x128xf32>
    %cst_105 = arith.constant 5.000000e-01 : f32
    %321 = vector.broadcast %cst_105 : f32 to vector<1x128xf32>
    %322 = arith.mulf %321, %320 : vector<1x128xf32>
    %cst_106 = arith.constant 5.000000e-01 : f32
    %323 = vector.broadcast %cst_106 : f32 to vector<1x128xf32>
    %324 = arith.addf %322, %323 : vector<1x128xf32>
    %325 = arith.mulf %314, %286 : vector<1x128xf32>
    %326 = arith.mulf %306, %316 : vector<1x128xf32>
    %327 = arith.addf %325, %326 : vector<1x128xf32>
    %328 = math.tanh %327 : vector<1x128xf32>
    %329 = arith.mulf %324, %328 : vector<1x128xf32>
    %330 = arith.index_cast %c7_i32 : i32 to index
    %c0_107 = arith.constant 0 : index
    %331 = vector.load %arg7[%330, %c0_107] : memref<8x128xf32, #tpu.memory_space<vmem>>, vector<1x128xf32>
    tpu.vector_store %arg7[%330, %c0_107], %329 {strides = array<i32>} : memref<8x128xf32, #tpu.memory_space<vmem>>, vector<1x128xf32>,
    %c8_i32 = arith.constant 8 : i32
    %c0_108 = arith.constant 0 : index
    %c0_109 = arith.constant 0 : index
    %332 = vector.load %arg7[%c0_108, %c0_109] : memref<8x128xf32, #tpu.memory_space<vmem>>, vector<8x128xf32>
    %c0_110 = arith.constant 0 : index
    %c0_111 = arith.constant 0 : index
    %333 = vector.load %arg4[%c0_110, %c0_111] : memref<128x128xf32, #tpu.memory_space<vmem>>, vector<128x128xf32>
    %cst_112 = arith.constant dense<0.000000e+00> : vector<8x128xf32>
    %334 = tpu.matmul %332, %333, %cst_112 {dimension_numbers = #tpu.dot_dimension_numbers<[1], [0], [0], [1], [0, 0, 1, 1], [], []>} : vector<8x128xf32>, vector<128x128xf32>, vector<8x128xf32> -> vector<8x128xf32>
    %c0_113 = arith.constant 0 : index
    %335 = memref.load %arg5[%c0_113] : memref<1xf32, #tpu.memory_space<smem>>
    %336 = vector.broadcast %335 : f32 to vector<8x128xf32>
    %337 = arith.addf %334, %336 : vector<8x128xf32>
    %c0_114 = arith.constant 0 : index
    %c0_115 = arith.constant 0 : index
    %338 = vector.load %arg6[%c0_114, %c0_115] : memref<8x128xf32, #tpu.memory_space<vmem>>, vector<8x128xf32>
    tpu.vector_store %arg6[%c0_114, %c0_115], %337 {strides = array<i32>} : memref<8x128xf32, #tpu.memory_space<vmem>>, vector<8x128xf32>,
    return
  }
}

</mosaic_0001>

<bundles_post_ra>
// kernel: tpu_custom_call.1
= control target key start
LH: loop header
LB: loop body
LE: loop exit
PB: predicated region body
PF: predicated region fallthrough
CT: control target
= control target key end

     0   :  { %12 = vsyncpa [#allocation7], 0  ;;  %s2736_s0 = inlined_call_operand.hbm [shape: f32[8], index: 0, kind: input, shape index: {}]   ;;  %s2737_s1 = inlined_call_operand.hbm [shape: f32[1,512], index: 1, kind: input, shape index: {}]   ;;  %s2738_s2 = inlined_call_operand.hbm [shape: f32[128,512], index: 2, kind: input, shape index: {}]   ;;  %s2739_s3 = inlined_call_operand.vmem [shape: f32[1,512], index: 3, kind: input, shape index: {}]   ;;  %s2740_s4 = inlined_call_operand.hbm [shape: f32[128,128], index: 4, kind: input, shape index: {}]   ;;  %s2741_s5 = inlined_call_operand.<no memory space> [shape: f32[1], index: 5, kind: input, shape index: {}]   ;;  %s2742_s6 = inlined_call_operand.hbm [shape: f32[8,128], index: 6, kind: output, shape index: {}]  }
   0x1   :  { %13 = vsyncpa [#allocation5], 0 }
   0x2   :  { %14 = vsyncpa [#allocation10], 0  ;;  %s40_s23 = sshll.u32 %s2738_s2, 4  ;;  %s41_s23 = int_to_ptr.hbm [resolvable:$true] %s40_s23 }
   0x3   :  { %15 = vsyncpa [#allocation6], 0  ;;  %s1850_s24 = smov [#allocation9]   ;;  %s21_s28 = sshll.u32 %s2736_s0, 4  ;;  %s22_s28 = int_to_ptr.hbm [resolvable:$true] %s21_s28 }
   0x4   :  { %s42_s25 = sshll.u32 %s1850_s24, 4  ;;  %s1851_s29 = smov 512   ;;  %s43_s25 = int_to_ptr.vmem [resolvable:$true] %s42_s25 }
   0x5   :  { %s1852_s30 = smov 32   ;;  %s1853_s7 = smov [#allocation4]  }
   0x6   :  { %48 = dma.hbm_to_vmem [thread:$0]  %s41_s23, 8192, %s43_s25, [#allocation10], %s1851_s29, %s1851_s29, %s1852_s30  }
   0x7   :  { %24 = dma.hbm_to_smem %s22_s28, 16, %s1853_s7, [#allocation7]  }
   0x8   :  { %s30_s10 = sshll.u32 %s2737_s1, 4  ;;  %s1854_s2 = smov [#allocation8]   ;;  %s31_s10 = int_to_ptr.hbm [resolvable:$true] %s30_s10 }
   0x9   :  { %s32_s11 = sshll.u32 %s1854_s2, 4  ;;  %s55_s14 = sshll.u32 %s2740_s4, 4  ;;  %s33_s11 = int_to_ptr.vmem [resolvable:$true] %s32_s11  ;;  %s56_s14 = int_to_ptr.hbm [resolvable:$true] %s55_s14 }
   0xa   :  { %35 = dma.hbm_to_vmem [thread:$0]  %s31_s10, 64, %s33_s11, [#allocation5]  }
   0xb   :  { %s1855_s0 = smov [#allocation11]   ;;  %s1856_s16 = smov 128  }
   0xc   :  { %s57_s15 = sshll.u32 %s1855_s0, 4  ;;  %s1857_s17 = smov 8   ;;  %s58_s15 = int_to_ptr.vmem [resolvable:$true] %s57_s15 }
   0xd   :  { %63 = dma.hbm_to_vmem [thread:$0]  %s56_s14, 2048, %s58_s15, [#allocation10], %s1856_s16, %s1856_s16, %s1857_s17  }
   0xe   :  { %1842 = dma.done.wait [#allocation7], 16  }
   0xf   :  { %1843 = vsyncadd [#allocation7], 4294967280 }
  0x10   :  { %1844 = dma.done.wait [#allocation5], 64  }
  0x11   :  { %1845 = vsyncadd [#allocation5], 4294967232 }
  0x12   :  { %1846 = dma.done.wait [#allocation10], 10240  }
  0x13   :  { %1847 = vsyncadd [#allocation10], 4294957056 }
  0x14   :  { %82 = sfence }
  0x15   :  { %v1907_v0 = vld [vmem:[#allocation9 + $0x1f0] sm:$0xff]  ;;  %v1909_v1 = vld [vmem:[#allocation9 + $0x1f8] sm:$0xff]  ;;  %v1921_v6 = vld [vmem:[#allocation9 + $0x1e8] sm:$0xff]  ;;  %v1858_v62 = vmov 0.0   ;;  %s85_s1 = sld [smem:[#allocation4]]  ;;  %vm240_vm0 = vcmask 1040384  }
  0x16   :  { %v1911_v2 = vld [vmem:[#allocation9 + $0x1d0] sm:$0xff]  ;;  %193 = vmatpush.msra.mxu2 %v1907_v0  ;;  %213 = vmatpush.msra.mxu3 %v1909_v1  ;;  %v1915_v3 = vld [vmem:[#allocation9 + $0x1d8] sm:$0xff]  ;;  %v1925_v7 = vld [vmem:[#allocation9 + $0x1e0] sm:$0xff]  ;;  %vm242_vm1 = vcmask 1042434   ;;  %vm244_vm2 = vcmask 1041408   ;;  %s1635_s19 = sld [smem:[#allocation4 + $0x1]] }
  0x17   :  { %v1917_v4 = vld [vmem:[#allocation9 + $0x1b0] sm:$0xff]  ;;  %v1919_v5 = vld [vmem:[#allocation9 + $0x1b8] sm:$0xff]  ;;  %v1927_v8 = vld [vmem:[#allocation9 + $0x1c8] sm:$0xff]  ;;  %173 = vmatpush.msra.mxu1 %v1921_v6  ;;  %153 = vmatpush.msra.mxu0 %v1925_v7  ;;  %s1636_s20 = sld [smem:[#allocation4 + $0x2]]  ;;  %s1859_s29 = smov [#allocation12]  }
  0x18   :  { %194 = vmatpush.msra.mxu2 %v1911_v2  ;;  %214 = vmatpush.msra.mxu3 %v1915_v3  ;;  %v1930_v9 = vld [vmem:[#allocation9 + $0x190] sm:$0xff]  ;;  %v1932_v10 = vld [vmem:[#allocation9 + $0x198] sm:$0xff]  ;;  %v1935_v11 = vld [vmem:[#allocation9 + $0x1c0] sm:$0xff]  ;;  %s2442_s21 = sld [smem:[#allocation4 + $0x3]]  ;;  %s1621_s30 = sshll.u32 %s1859_s29, 4  ;;  %s1622_s30 = int_to_ptr.vmem [resolvable:$true] %s1621_s30 }
  0x19   :  { %v1939_v12 = vld [vmem:[#allocation9 + $0x1a8] sm:$0xff]  ;;  %v1941_v13 = vld [vmem:[#allocation9 + $0x1a0] sm:$0xff]  ;;  %174 = vmatpush.msra.mxu1 %v1927_v8  ;;  %v1944_v14 = vld [vmem:[#allocation9 + $0x170] sm:$0xff]  ;;  %154 = vmatpush.msra.mxu0 %v1935_v11  ;;  %s1638_s22 = sld [smem:[#allocation4 + $0x4]]  ;;  %s1623_s9 = sshll.u32 %s2742_s6, 4  ;;  %s1624_s9 = int_to_ptr.hbm [resolvable:$true] %s1623_s9 }
  0x1a   :  { %195 = vmatpush.msra.mxu2 %v1917_v4  ;;  %215 = vmatpush.msra.mxu3 %v1919_v5  ;;  %v1946_v15 = vld [vmem:[#allocation9 + $0x178] sm:$0xff]  ;;  %v1951_v16 = vld [vmem:[#allocation9 + $0x188] sm:$0xff]  ;;  %v1953_v17 = vld [vmem:[#allocation9 + $0x180] sm:$0xff]  ;;  %s1640_s25 = sld [smem:[#allocation4 + $0x6]] }
  0x1b   :  { %175 = vmatpush.msra.mxu1 %v1939_v12  ;;  %v1956_v18 = vld [vmem:[#allocation9 + $0x150] sm:$0xff]  ;;  %v1958_v19 = vld [vmem:[#allocation9 + $0x158] sm:$0xff]  ;;  %155 = vmatpush.msra.mxu0 %v1941_v13  ;;  %v1963_v20 = vld [vmem:[#allocation9 + $0x168] sm:$0xff]  ;;  %s1641_s26 = sld [smem:[#allocation4 + $0x7]] }
  0x1c   :  { %196 = vmatpush.msra.mxu2 %v1930_v9  ;;  %216 = vmatpush.msra.mxu3 %v1932_v10  ;;  %v1965_v21 = vld [vmem:[#allocation9 + $0x160] sm:$0xff]  ;;  %v1968_v22 = vld [vmem:[#allocation9 + $0x130] sm:$0xff]  ;;  %v1970_v23 = vld [vmem:[#allocation9 + $0x138] sm:$0xff] }
  0x1d   :  { %176 = vmatpush.msra.mxu1 %v1951_v16  ;;  %156 = vmatpush.msra.mxu0 %v1953_v17  ;;  %v1975_v24 = vld [vmem:[#allocation9 + $0x148] sm:$0xff]  ;;  %v1977_v25 = vld [vmem:[#allocation9 + $0x140] sm:$0xff]  ;;  %v1980_v26 = vld [vmem:[#allocation9 + $0x110] sm:$0xff] }
  0x1e   :  { %197 = vmatpush.msra.mxu2 %v1944_v14  ;;  %217 = vmatpush.msra.mxu3 %v1946_v15  ;;  %v1982_v27 = vld [vmem:[#allocation9 + $0x118] sm:$0xff]  ;;  %v1987_v28 = vld [vmem:[#allocation9 + $0x128] sm:$0xff]  ;;  %v1989_v29 = vld [vmem:[#allocation9 + $0x120] sm:$0xff] }
  0x1f   :  { %177 = vmatpush.msra.mxu1 %v1963_v20  ;;  %157 = vmatpush.msra.mxu0 %v1965_v21  ;;  %v1992_v30 = vld [vmem:[#allocation9 + $0xf0] sm:$0xff]  ;;  %v1994_v31 = vld [vmem:[#allocation9 + $0xf8] sm:$0xff]  ;;  %v1999_v32 = vld [vmem:[#allocation9 + $0x108] sm:$0xff] }
  0x20   :  { %198 = vmatpush.msra.mxu2 %v1956_v18  ;;  %218 = vmatpush.msra.mxu3 %v1958_v19  ;;  %v2001_v33 = vld [vmem:[#allocation9 + $0x100] sm:$0xff]  ;;  %v2004_v34 = vld [vmem:[#allocation9 + $0xd0] sm:$0xff]  ;;  %v2006_v35 = vld [vmem:[#allocation9 + $0xd8] sm:$0xff] }
  0x21   :  { %178 = vmatpush.msra.mxu1 %v1975_v24  ;;  %158 = vmatpush.msra.mxu0 %v1977_v25  ;;  %v2011_v36 = vld [vmem:[#allocation9 + $0xe8] sm:$0xff]  ;;  %v2013_v37 = vld [vmem:[#allocation9 + $0xe0] sm:$0xff]  ;;  %v2016_v38 = vld [vmem:[#allocation9 + $0xb0] sm:$0xff] }
  0x22   :  { %199 = vmatpush.msra.mxu2 %v1968_v22  ;;  %219 = vmatpush.msra.mxu3 %v1970_v23  ;;  %v2018_v39 = vld [vmem:[#allocation9 + $0xb8] sm:$0xff]  ;;  %v2023_v40 = vld [vmem:[#allocation9 + $0xc8] sm:$0xff]  ;;  %v2025_v41 = vld [vmem:[#allocation9 + $0xc0] sm:$0xff] }
  0x23   :  { %179 = vmatpush.msra.mxu1 %v1987_v28  ;;  %159 = vmatpush.msra.mxu0 %v1989_v29  ;;  %v2028_v42 = vld [vmem:[#allocation9 + $0x90] sm:$0xff]  ;;  %v2030_v43 = vld [vmem:[#allocation9 + $0x98] sm:$0xff]  ;;  %v2035_v44 = vld [vmem:[#allocation9 + $0xa8] sm:$0xff] }
  0x24   :  { %200 = vmatpush.msra.mxu2 %v1980_v26  ;;  %220 = vmatpush.msra.mxu3 %v1982_v27  ;;  %v2037_v45 = vld [vmem:[#allocation9 + $0xa0] sm:$0xff]  ;;  %v2040_v46 = vld [vmem:[#allocation9 + $0x70] sm:$0xff]  ;;  %v2042_v47 = vld [vmem:[#allocation9 + $0x78] sm:$0xff] }
  0x25   :  { %180 = vmatpush.msra.mxu1 %v1999_v32  ;;  %160 = vmatpush.msra.mxu0 %v2001_v33  ;;  %v2047_v48 = vld [vmem:[#allocation9 + $0x88] sm:$0xff]  ;;  %v2049_v49 = vld [vmem:[#allocation9 + $0x80] sm:$0xff]  ;;  %v2052_v50 = vld [vmem:[#allocation9 + $0x50] sm:$0xff] }
  0x26   :  { %201 = vmatpush.msra.mxu2 %v1992_v30  ;;  %221 = vmatpush.msra.mxu3 %v1994_v31  ;;  %v2054_v51 = vld [vmem:[#allocation9 + $0x58] sm:$0xff]  ;;  %v2059_v52 = vld [vmem:[#allocation9 + $0x68] sm:$0xff]  ;;  %v2061_v53 = vld [vmem:[#allocation9 + $0x60] sm:$0xff] }
  0x27   :  { %181 = vmatpush.msra.mxu1 %v2011_v36  ;;  %161 = vmatpush.msra.mxu0 %v2013_v37  ;;  %v2064_v54 = vld [vmem:[#allocation9 + $0x30] sm:$0xff]  ;;  %v2066_v55 = vld [vmem:[#allocation9 + $0x38] sm:$0xff]  ;;  %v2071_v56 = vld [vmem:[#allocation9 + $0x48] sm:$0xff] }
  0x28   :  { %202 = vmatpush.msra.mxu2 %v2004_v34  ;;  %222 = vmatpush.msra.mxu3 %v2006_v35  ;;  %2771 = vst [vmem:[#allocation17_spill] sm:$0xff] %v2064_v54  ;;  %v2073_v57 = vld [vmem:[#allocation9 + $0x40] sm:$0xff]  ;;  %v2076_v58 = vld [vmem:[#allocation9 + $0x10] sm:$0xff]  ;;  %v2078_v59 = vld [vmem:[#allocation9 + $0x18] sm:$0xff] }
  0x29   :  { %182 = vmatpush.msra.mxu1 %v2023_v40  ;;  %162 = vmatpush.msra.mxu0 %v2025_v41  ;;  %v2085_v60 = vld [vmem:[#allocation9 + $0x28] sm:$0xff]  ;;  %v2087_v61 = vld [vmem:[#allocation9 + $0x20] sm:$0xff] }
  0x2a   :  { %203 = vmatpush.msra.mxu2 %v2016_v38  ;;  %223 = vmatpush.msra.mxu3 %v2018_v39  ;;  %v2091_v63 = vld [vmem:[#allocation9 + $0x8] sm:$0xff] }
  0x2b   :  { %183 = vmatpush.msra.mxu1 %v2035_v44  ;;  %163 = vmatpush.msra.mxu0 %v2037_v45 }
  0x2c   :  { %204 = vmatpush.msra.mxu2 %v2028_v42  ;;  %224 = vmatpush.msra.mxu3 %v2030_v43 }
  0x2d   :  { %184 = vmatpush.msra.mxu1 %v2047_v48  ;;  %164 = vmatpush.msra.mxu0 %v2049_v49 }
  0x2e   :  { %205 = vmatpush.msra.mxu2 %v2040_v46  ;;  %225 = vmatpush.msra.mxu3 %v2042_v47 }
  0x2f   :  { %185 = vmatpush.msra.mxu1 %v2059_v52  ;;  %165 = vmatpush.msra.mxu0 %v2061_v53 }
  0x30   :  { %206 = vmatpush.msra.mxu2 %v2052_v50  ;;  %226 = vmatpush.msra.mxu3 %v2054_v51 }
  0x31   :  { %186 = vmatpush.msra.mxu1 %v2071_v56  ;;  %166 = vmatpush.msra.mxu0 %v2073_v57 }
  0x32   :  { %207 = vmatpush.msra.mxu2 %v2064_v54  ;;  %227 = vmatpush.msra.mxu3 %v2066_v55  ;;  %v2093_v54 = vld [vmem:[#allocation9] sm:$0xff] }
  0x33   :  { %187 = vmatpush.msra.mxu1 %v2085_v60  ;;  %167 = vmatpush.msra.mxu0 %v2087_v61 }
  0x34   :  { %208 = vmatpush.msra.mxu2 %v2076_v58  ;;  %228 = vmatpush.msra.mxu3 %v2078_v59 }
  0x35   :  { %209 = vmatmul.f32.vlgmr.msra.gmra.mxu2 %v1858_v62  ;;  %229 = vmatmul.f32.vlgmr.msra.gmra.mxu3 %v1858_v62 }
  0x36   :  { %382 = vmatpush.msrb.mxu2 %v1907_v0  ;;  %402 = vmatpush.msrb.mxu3 %v1909_v1 }
  0x37   :  { %188 = vmatpush.msra.mxu1 %v2091_v63  ;;  %168 = vmatpush.msra.mxu0 %v2093_v54 }
  0x38   :  { %189 = vmatmul.f32.vlgmr.msra.gmra.mxu1 %v1858_v62  ;;  %169 = vmatmul.f32.vlgmr.msra.gmra.mxu0 %v1858_v62  ;;  %v2772_v62 = vld [vmem:[#allocation17_spill] sm:$0xff] }
  0x39   :  { %342 = vmatpush.msrb.mxu0 %v1925_v7  ;;  %362 = vmatpush.msrb.mxu1 %v1921_v6 }
  0x3a   :  { %383 = vmatpush.msrb.mxu2 %v1911_v2  ;;  %403 = vmatpush.msrb.mxu3 %v1915_v3 }
  0x3b   :  { %343 = vmatpush.msrb.mxu0 %v1935_v11  ;;  %363 = vmatpush.msrb.mxu1 %v1927_v8 }
  0x3c   :  { %384 = vmatpush.msrb.mxu2 %v1917_v4  ;;  %404 = vmatpush.msrb.mxu3 %v1919_v5 }
  0x3d   :  { %344 = vmatpush.msrb.mxu0 %v1941_v13  ;;  %364 = vmatpush.msrb.mxu1 %v1939_v12 }
  0x3e   :  { %385 = vmatpush.msrb.mxu2 %v1930_v9  ;;  %405 = vmatpush.msrb.mxu3 %v1932_v10 }
  0x3f   :  { %345 = vmatpush.msrb.mxu0 %v1953_v17  ;;  %365 = vmatpush.msrb.mxu1 %v1951_v16 }
  0x40   :  { %386 = vmatpush.msrb.mxu2 %v1944_v14  ;;  %406 = vmatpush.msrb.mxu3 %v1946_v15 }
  0x41   :  { %346 = vmatpush.msrb.mxu0 %v1965_v21  ;;  %366 = vmatpush.msrb.mxu1 %v1963_v20 }
  0x42   :  { %387 = vmatpush.msrb.mxu2 %v1956_v18  ;;  %407 = vmatpush.msrb.mxu3 %v1958_v19 }
  0x43   :  { %347 = vmatpush.msrb.mxu0 %v1977_v25  ;;  %367 = vmatpush.msrb.mxu1 %v1975_v24 }
  0x44   :  { %388 = vmatpush.msrb.mxu2 %v1968_v22  ;;  %408 = vmatpush.msrb.mxu3 %v1970_v23 }
  0x45   :  { %348 = vmatpush.msrb.mxu0 %v1989_v29  ;;  %368 = vmatpush.msrb.mxu1 %v1987_v28 }
  0x46   :  { %389 = vmatpush.msrb.mxu2 %v1980_v26  ;;  %409 = vmatpush.msrb.mxu3 %v1982_v27 }
  0x47   :  { %349 = vmatpush.msrb.mxu0 %v2001_v33  ;;  %369 = vmatpush.msrb.mxu1 %v1999_v32 }
  0x48   :  { %390 = vmatpush.msrb.mxu2 %v1992_v30  ;;  %410 = vmatpush.msrb.mxu3 %v1994_v31 }
  0x49   :  { %350 = vmatpush.msrb.mxu0 %v2013_v37  ;;  %370 = vmatpush.msrb.mxu1 %v2011_v36 }
  0x4a   :  { %391 = vmatpush.msrb.mxu2 %v2004_v34  ;;  %411 = vmatpush.msrb.mxu3 %v2006_v35 }
  0x4b   :  { %351 = vmatpush.msrb.mxu0 %v2025_v41  ;;  %371 = vmatpush.msrb.mxu1 %v2023_v40 }
  0x4c   :  { %392 = vmatpush.msrb.mxu2 %v2016_v38  ;;  %412 = vmatpush.msrb.mxu3 %v2018_v39 }
  0x4d   :  { %352 = vmatpush.msrb.mxu0 %v2037_v45  ;;  %372 = vmatpush.msrb.mxu1 %v2035_v44 }
  0x4e   :  { %393 = vmatpush.msrb.mxu2 %v2028_v42  ;;  %413 = vmatpush.msrb.mxu3 %v2030_v43 }
  0x4f   :  { %353 = vmatpush.msrb.mxu0 %v2049_v49  ;;  %373 = vmatpush.msrb.mxu1 %v2047_v48 }
  0x50   :  { %394 = vmatpush.msrb.mxu2 %v2040_v46  ;;  %414 = vmatpush.msrb.mxu3 %v2042_v47 }
  0x51   :  { %354 = vmatpush.msrb.mxu0 %v2061_v53  ;;  %374 = vmatpush.msrb.mxu1 %v2059_v52 }
  0x52   :  { %395 = vmatpush.msrb.mxu2 %v2052_v50  ;;  %415 = vmatpush.msrb.mxu3 %v2054_v51 }
  0x53   :  { %355 = vmatpush.msrb.mxu0 %v2073_v57  ;;  %375 = vmatpush.msrb.mxu1 %v2071_v56 }
  0x54   :  { %396 = vmatpush.msrb.mxu2 %v2772_v62  ;;  %416 = vmatpush.msrb.mxu3 %v2066_v55 }
  0x55   :  { %356 = vmatpush.msrb.mxu0 %v2087_v61  ;;  %376 = vmatpush.msrb.mxu1 %v2085_v60 }
  0x56   :  { %397 = vmatpush.msrb.mxu2 %v2076_v58  ;;  %417 = vmatpush.msrb.mxu3 %v2078_v59 }
  0x57   :  { %357 = vmatpush.msrb.mxu0 %v2093_v54  ;;  %377 = vmatpush.msrb.mxu1 %v2091_v63 }
  0x58   :  { %568 = vmatpush.msra.mxu2 %v1907_v0  ;;  %588 = vmatpush.msra.mxu3 %v1909_v1 }
  0x59   :  { %528 = vmatpush.msra.mxu0 %v1925_v7  ;;  %548 = vmatpush.msra.mxu1 %v1921_v6 }
  0x5a   :  { %569 = vmatpush.msra.mxu2 %v1911_v2  ;;  %589 = vmatpush.msra.mxu3 %v1915_v3  ;;  %v2227_v2 = vld [vmem:[#allocation8] sm:$0xf]  ;;  %v86_v3 = vstv %s85_s1 }
  0x5b   :  { %529 = vmatpush.msra.mxu0 %v1935_v11  ;;  %549 = vmatpush.msra.mxu1 %v1927_v8  ;;  %2773 = vst [vmem:[#allocation17_spill] sm:$0xff] %v2227_v2 }
  0x5c   :  { %570 = vmatpush.msra.mxu2 %v1917_v4  ;;  %590 = vmatpush.msra.mxu3 %v1919_v5  ;;  %v87_v4 = vmul.f32 %v86_v3, %v2227_v2  ;;  %v2233_v5 = vld [vmem:[%s2739_s3] sm:$0xf] }
  0x5d   :  { %530 = vmatpush.msra.mxu0 %v1941_v13  ;;  %550 = vmatpush.msra.mxu1 %v1939_v12 }
  0x5e   :  { %571 = vmatpush.msra.mxu2 %v1930_v9  ;;  %591 = vmatpush.msra.mxu3 %v1932_v10 }
  0x5f   :  { %531 = vmatpush.msra.mxu0 %v1953_v17  ;;  %551 = vmatpush.msra.mxu1 %v1951_v16 }
  0x60   :  { %572 = vmatpush.msra.mxu2 %v1944_v14  ;;  %592 = vmatpush.msra.mxu3 %v1946_v15 }
  0x61   :  { %532 = vmatpush.msra.mxu0 %v1965_v21  ;;  %552 = vmatpush.msra.mxu1 %v1963_v20 }
  0x62   :  { %573 = vmatpush.msra.mxu2 %v1956_v18  ;;  %593 = vmatpush.msra.mxu3 %v1958_v19  ;;  %v88_v19 = vadd.f32 %v87_v4, %v2233_v5 }
  0x63   :  { %533 = vmatpush.msra.mxu0 %v1977_v25  ;;  %553 = vmatpush.msra.mxu1 %v1975_v24 }
  0x64   :  { %574 = vmatpush.msra.mxu2 %v1968_v22  ;;  %594 = vmatpush.msra.mxu3 %v1970_v23 }
  0x65   :  { %534 = vmatpush.msra.mxu0 %v1989_v29  ;;  %554 = vmatpush.msra.mxu1 %v1987_v28 }
  0x66   :  { %575 = vmatpush.msra.mxu2 %v1980_v26  ;;  %595 = vmatpush.msra.mxu3 %v1982_v27 }
  0x67   :  { %535 = vmatpush.msra.mxu0 %v2001_v33  ;;  %555 = vmatpush.msra.mxu1 %v1999_v32 }
  0x68   :  { %576 = vmatpush.msra.mxu2 %v1992_v30  ;;  %596 = vmatpush.msra.mxu3 %v1994_v31 }
  0x69   :  { %536 = vmatpush.msra.mxu0 %v2013_v37  ;;  %556 = vmatpush.msra.mxu1 %v2011_v36 }
  0x6a   :  { %577 = vmatpush.msra.mxu2 %v2004_v34  ;;  %597 = vmatpush.msra.mxu3 %v2006_v35 }
  0x6b   :  { %537 = vmatpush.msra.mxu0 %v2025_v41  ;;  %557 = vmatpush.msra.mxu1 %v2023_v40 }
  0x6c   :  { %578 = vmatpush.msra.mxu2 %v2016_v38  ;;  %598 = vmatpush.msra.mxu3 %v2018_v39 }
  0x6d   :  { %538 = vmatpush.msra.mxu0 %v2037_v45  ;;  %558 = vmatpush.msra.mxu1 %v2035_v44 }
  0x6e   :  { %579 = vmatpush.msra.mxu2 %v2028_v42  ;;  %599 = vmatpush.msra.mxu3 %v2030_v43 }
  0x6f   :  { %539 = vmatpush.msra.mxu0 %v2049_v49  ;;  %559 = vmatpush.msra.mxu1 %v2047_v48 }
  0x70   :  { %580 = vmatpush.msra.mxu2 %v2040_v46  ;;  %600 = vmatpush.msra.mxu3 %v2042_v47 }
  0x71   :  { %540 = vmatpush.msra.mxu0 %v2061_v53  ;;  %560 = vmatpush.msra.mxu1 %v2059_v52 }
  0x72   :  { %581 = vmatpush.msra.mxu2 %v2052_v50  ;;  %601 = vmatpush.msra.mxu3 %v2054_v51 }
  0x73   :  { %541 = vmatpush.msra.mxu0 %v2073_v57  ;;  %561 = vmatpush.msra.mxu1 %v2071_v56 }
  0x74   :  { %582 = vmatpush.msra.mxu2 %v2772_v62  ;;  %602 = vmatpush.msra.mxu3 %v2066_v55 }
  0x75   :  { %542 = vmatpush.msra.mxu0 %v2087_v61  ;;  %562 = vmatpush.msra.mxu1 %v2085_v60 }
  0x76   :  { %583 = vmatpush.msra.mxu2 %v2076_v58  ;;  %603 = vmatpush.msra.mxu3 %v2078_v59 }
  0x77   :  { %543 = vmatpush.msra.mxu0 %v2093_v54  ;;  %563 = vmatpush.msra.mxu1 %v2091_v63 }
  0xb5   :  { %v190_v9 = vpop.f32.mrf.mxu1  ;;  %v170_v10 = vpop.f32.mrf.mxu0 }
  0xb6   :  { %v237_v14 = vrot.slane %v190_v9, 7 }
  0xb8   :  { %v210_v15 = vpop.f32.mrf.mxu2  ;;  %v230_v18 = vpop.f32.mrf.mxu3  ;;  %v241_v26 = vsel %vm240_vm0, %v170_v10, %v237_v14 }
  0xb9   :  { %v238_v22 = vrot.slane %v210_v15, 6  ;;  %v239_v23 = vrot.slane %v230_v18, 5 }
  0xbb   :  { %v243_v27 = vsel %vm242_vm1, %v238_v22, %v239_v23  ;;  %v2285_v22 = vld [vmem:[#allocation9 + $0x1d0] sm:$0xff]  ;;  %v2287_v23 = vld [vmem:[#allocation9 + $0x1d8] sm:$0xff] }
  0xbc   :  { %v245_v30 = vsel %vm244_vm2, %v241_v26, %v243_v27  ;;  %v2291_v26 = vld [vmem:[#allocation9 + $0x1b0] sm:$0xff]  ;;  %v2293_v27 = vld [vmem:[#allocation9 + $0x1b8] sm:$0xff] }
  0xbd   :  { %v247_v31 = vadd.f32 %v245_v30, %v88_v19  ;;  %v2297_v30 = vld [vmem:[#allocation9 + $0x190] sm:$0xff] }
  0xbf   :  { %v248_v34 = vmul.f32 0.5, %v247_v31  ;;  %v253_v35 = vrot.slane %v247_v31, 1  ;;  %v262_v39 = vrot.slane %v247_v31, 3  ;;  %v259_v42 = vrot.slane %v247_v31, 2  ;;  %v2299_v31 = vld [vmem:[#allocation9 + $0x198] sm:$0xff] }
  0xc1   :  { %1652 = vtanh.f32 %v248_v34  ;;  %v255_v38 = vmul.f32 0.5, %v253_v35  ;;  %v264_v43 = vmul.f32 0.5, %v262_v39  ;;  %v2303_v34 = vld [vmem:[#allocation9 + $0x170] sm:$0xff]  ;;  %v2305_v35 = vld [vmem:[#allocation9 + $0x178] sm:$0xff] }
  0xc2   :  { %v2311_v39 = vld [vmem:[#allocation9 + $0x158] sm:$0xff] }
  0xc3   :  { %1654 = vtanh.f32 %v255_v38  ;;  %v2309_v38 = vld [vmem:[#allocation9 + $0x150] sm:$0xff] }
  0xc4   :  { %1656 = vtanh.f32 %v259_v42  ;;  %v2315_v42 = vld [vmem:[#allocation9 + $0x130] sm:$0xff] }
  0xc5   :  { %1658 = vtanh.f32 %v264_v43  ;;  %v2317_v43 = vld [vmem:[#allocation9 + $0x138] sm:$0xff] }
  0xc7   :  { %v1653_v46 = vpop.eup %1652 }
  0xc8   :  { %v250_v47 = vmul.f32 0.5, %v1653_v46  ;;  %v2321_v46 = vld [vmem:[#allocation9 + $0x110] sm:$0xff] }
  0xc9   :  { %v1655_v50 = vpop.eup %1654 }
  0xca   :  { %v251_v51 = vadd.f32 0.5, %v250_v47  ;;  %v257_v55 = vmul.f32 0.5, %v1655_v50  ;;  %v1657_v59 = vpop.eup %1656  ;;  %v2323_v47 = vld [vmem:[#allocation9 + $0x118] sm:$0xff]  ;;  %v2327_v50 = vld [vmem:[#allocation9 + $0xf0] sm:$0xff] }
  0xcb   :  { %v1659_v4 = vpop.eup %1658 }
  0xcc   :  { %v258_v58 = vadd.f32 0.5, %v257_v55  ;;  %v269_v3 = vmul.f32 %v1657_v59, %v251_v51  ;;  %v266_v10 = vmul.f32 0.5, %v1659_v4  ;;  %v2329_v51 = vld [vmem:[#allocation9 + $0xf8] sm:$0xff]  ;;  %v2333_v55 = vld [vmem:[#allocation9 + $0xd0] sm:$0xff] }
  0xcd   :  { %v2337_v59 = vld [vmem:[#allocation9 + $0xb0] sm:$0xff]  ;;  %v2345_v4 = vld [vmem:[#allocation9 + $0x98] sm:$0xff] }
  0xce   :  { %v268_v62 = vmul.f32 0.0, %v258_v58  ;;  %v267_v14 = vadd.f32 0.5, %v266_v10  ;;  %v2335_v58 = vld [vmem:[#allocation9 + $0xd8] sm:$0xff]  ;;  %2774 = vst [vmem:[#allocation18_spill] sm:$0xff] %v2337_v59  ;;  %v2349_v10 = vld [vmem:[#allocation9 + $0x70] sm:$0xff] }
  0xcf   :  { %2777 = vst [vmem:[#allocation21_spill] sm:$0xff] %v2345_v4 }
  0xd0   :  { %v2239_v9 = vadd.f32 %v269_v3, %v268_v62  ;;  %v2341_v62 = vld [vmem:[#allocation9 + $0xb8] sm:$0xff]  ;;  %v2343_v3 = vld [vmem:[#allocation9 + $0x90] sm:$0xff]  ;;  %2778 = vst [vmem:[#allocation22_spill] sm:$0xff] %v2349_v10 }
  0xd1   :  { %2775 = vst [vmem:[#allocation19_spill] sm:$0xff] %v2341_v62 }
  0xd2   :  { %1660 = vtanh.f32 %v2239_v9  ;;  %2776 = vst [vmem:[#allocation20_spill] sm:$0xff] %v2343_v3 }
  0xd8   :  { %v1661_v15 = vpop.eup %1660 }
  0xd9   :  { %v272_v18 = vmul.f32 %v1661_v15, %v267_v14  ;;  %v2351_v14 = vld [vmem:[#allocation9 + $0x78] sm:$0xff] }
  0xda   :  { %2779 = vst [vmem:[#allocation23_spill] sm:$0xff] %v2351_v14 }
  0xdb   :  { %273 = vst [vmem:[#allocation2] sm:$0x1] %v272_v18  ;;  %358 = vmatmul.f32.vlgmr.msrb.gmra.mxu0 %v272_v18  ;;  %378 = vmatmul.f32.vlgmr.msrb.gmra.mxu1 %v272_v18 }
  0xdc   :  { %398 = vmatmul.f32.vlgmr.msrb.gmra.mxu2 %v272_v18  ;;  %418 = vmatmul.f32.vlgmr.msrb.gmra.mxu3 %v272_v18  ;;  %v2355_v18 = vld [vmem:[#allocation9 + $0x50] sm:$0xff] }
  0xdd   :  { %714 = vmatpush.msrb.mxu0 %v1925_v7  ;;  %734 = vmatpush.msrb.mxu1 %v1921_v6  ;;  %2780 = vst [vmem:[#allocation24_spill] sm:$0xff] %v2355_v18 }
  0xde   :  { %754 = vmatpush.msrb.mxu2 %v1907_v0  ;;  %774 = vmatpush.msrb.mxu3 %v1909_v1  ;;  %v275_v0 = vstv %s1635_s19 }
  0xdf   :  { %715 = vmatpush.msrb.mxu0 %v1935_v11  ;;  %735 = vmatpush.msrb.mxu1 %v1927_v8  ;;  %v276_v6 = vmul.f32 %v275_v0, %v2227_v2  ;;  %v2357_v0 = vld [vmem:[#allocation9 + $0x58] sm:$0xff] }
  0xe0   :  { %755 = vmatpush.msrb.mxu2 %v2285_v22  ;;  %775 = vmatpush.msrb.mxu3 %v2287_v23  ;;  %2781 = vst [vmem:[#allocation25_spill] sm:$0xff] %v2357_v0 }
  0xe1   :  { %716 = vmatpush.msrb.mxu0 %v1941_v13  ;;  %736 = vmatpush.msrb.mxu1 %v1939_v12  ;;  %v277_v13 = vadd.f32 %v276_v6, %v2233_v5  ;;  %v2362_v6 = vld [vmem:[#allocation9 + $0x30] sm:$0xff] }
  0xe2   :  { %756 = vmatpush.msrb.mxu2 %v2291_v26  ;;  %776 = vmatpush.msrb.mxu3 %v2293_v27 }
  0xe3   :  { %717 = vmatpush.msrb.mxu0 %v1953_v17  ;;  %737 = vmatpush.msrb.mxu1 %v1951_v16 }
  0xe4   :  { %757 = vmatpush.msrb.mxu2 %v2297_v30  ;;  %777 = vmatpush.msrb.mxu3 %v2299_v31 }
  0xe5   :  { %718 = vmatpush.msrb.mxu0 %v1965_v21  ;;  %738 = vmatpush.msrb.mxu1 %v1963_v20 }
  0xe6   :  { %758 = vmatpush.msrb.mxu2 %v2303_v34  ;;  %778 = vmatpush.msrb.mxu3 %v2305_v35 }
  0xe7   :  { %719 = vmatpush.msrb.mxu0 %v1977_v25  ;;  %739 = vmatpush.msrb.mxu1 %v1975_v24 }
  0xe8   :  { %759 = vmatpush.msrb.mxu2 %v2309_v38  ;;  %779 = vmatpush.msrb.mxu3 %v2311_v39 }
  0xe9   :  { %720 = vmatpush.msrb.mxu0 %v1989_v29  ;;  %740 = vmatpush.msrb.mxu1 %v1987_v28 }
  0xea   :  { %760 = vmatpush.msrb.mxu2 %v2315_v42  ;;  %780 = vmatpush.msrb.mxu3 %v2317_v43 }
  0xeb   :  { %721 = vmatpush.msrb.mxu0 %v2001_v33  ;;  %741 = vmatpush.msrb.mxu1 %v1999_v32 }
  0xec   :  { %761 = vmatpush.msrb.mxu2 %v2321_v46  ;;  %781 = vmatpush.msrb.mxu3 %v2323_v47 }
  0xed   :  { %722 = vmatpush.msrb.mxu0 %v2013_v37  ;;  %742 = vmatpush.msrb.mxu1 %v2011_v36 }
  0xee   :  { %762 = vmatpush.msrb.mxu2 %v2327_v50  ;;  %782 = vmatpush.msrb.mxu3 %v2329_v51 }
  0xef   :  { %723 = vmatpush.msrb.mxu0 %v2025_v41  ;;  %743 = vmatpush.msrb.mxu1 %v2023_v40 }
  0xf0   :  { %763 = vmatpush.msrb.mxu2 %v2333_v55  ;;  %783 = vmatpush.msrb.mxu3 %v2335_v58 }
  0xf1   :  { %724 = vmatpush.msrb.mxu0 %v2037_v45  ;;  %744 = vmatpush.msrb.mxu1 %v2035_v44 }
  0xf2   :  { %764 = vmatpush.msrb.mxu2 %v2337_v59  ;;  %784 = vmatpush.msrb.mxu3 %v2341_v62 }
  0xf3   :  { %725 = vmatpush.msrb.mxu0 %v2049_v49  ;;  %745 = vmatpush.msrb.mxu1 %v2047_v48 }
  0xf4   :  { %765 = vmatpush.msrb.mxu2 %v2343_v3  ;;  %785 = vmatpush.msrb.mxu3 %v2345_v4 }
  0xf5   :  { %726 = vmatpush.msrb.mxu0 %v2061_v53  ;;  %746 = vmatpush.msrb.mxu1 %v2059_v52 }
  0xf6   :  { %766 = vmatpush.msrb.mxu2 %v2349_v10  ;;  %786 = vmatpush.msrb.mxu3 %v2351_v14 }
  0xf7   :  { %727 = vmatpush.msrb.mxu0 %v2073_v57  ;;  %747 = vmatpush.msrb.mxu1 %v2071_v56 }
  0xf8   :  { %767 = vmatpush.msrb.mxu2 %v2355_v18  ;;  %787 = vmatpush.msrb.mxu3 %v2357_v0 }
  0xf9   :  { %728 = vmatpush.msrb.mxu0 %v2087_v61  ;;  %748 = vmatpush.msrb.mxu1 %v2085_v60 }
  0xfa   :  { %768 = vmatpush.msrb.mxu2 %v2362_v6 }
  0xfb   :  { %729 = vmatpush.msrb.mxu0 %v2093_v54  ;;  %749 = vmatpush.msrb.mxu1 %v2091_v63 }
 0x158   :  { %v379_v1 = vpop.f32.mrf.mxu1  ;;  %v359_v17 = vpop.f32.mrf.mxu0 }
 0x159   :  { %v426_v7 = vrot.slane %v379_v1, 7 }
 0x15b   :  { %v429_v20 = vsel %vm240_vm0, %v359_v17, %v426_v7  ;;  %v2364_v7 = vld [vmem:[#allocation9 + $0x38] sm:$0xff] }
 0x15c   :  { %788 = vmatpush.msrb.mxu3 %v2364_v7 }
 0x15f   :  { %v399_v8 = vpop.f32.mrf.mxu2  ;;  %v419_v11 = vpop.f32.mrf.mxu3 }
 0x160   :  { %v427_v12 = vrot.slane %v399_v8, 6  ;;  %v428_v16 = vrot.slane %v419_v11, 5 }
 0x162   :  { %v430_v21 = vsel %vm242_vm1, %v427_v12, %v428_v16  ;;  %v2370_v16 = vld [vmem:[#allocation9 + $0x18] sm:$0xff] }
 0x163   :  { %v431_v24 = vsel %vm244_vm2, %v429_v20, %v430_v21  ;;  %789 = vmatpush.msrb.mxu3 %v2370_v16 }
 0x164   :  { %v433_v25 = vadd.f32 %v431_v24, %v277_v13  ;;  %v2368_v13 = vld [vmem:[#allocation9 + $0x10] sm:$0xff] }
 0x165   :  { %769 = vmatpush.msrb.mxu2 %v2368_v13 }
 0x166   :  { %v434_v28 = vmul.f32 0.5, %v433_v25  ;;  %v439_v29 = vrot.slane %v433_v25, 1  ;;  %v448_v33 = vrot.slane %v433_v25, 3  ;;  %v445_v36 = vrot.slane %v433_v25, 2 }
 0x168   :  { %1662 = vtanh.f32 %v434_v28  ;;  %v441_v32 = vmul.f32 0.5, %v439_v29  ;;  %v450_v37 = vmul.f32 0.5, %v448_v33 }
 0x16a   :  { %1664 = vtanh.f32 %v441_v32 }
 0x16b   :  { %1666 = vtanh.f32 %v445_v36 }
 0x16c   :  { %1668 = vtanh.f32 %v450_v37 }
 0x16e   :  { %v1663_v40 = vpop.eup %1662 }
 0x16f   :  { %v436_v41 = vmul.f32 0.5, %v1663_v40 }
 0x170   :  { %v1665_v44 = vpop.eup %1664 }
 0x171   :  { %v437_v45 = vadd.f32 0.5, %v436_v41  ;;  %v443_v48 = vmul.f32 0.5, %v1665_v44  ;;  %v1667_v52 = vpop.eup %1666 }
 0x172   :  { %v1669_v56 = vpop.eup %1668 }
 0x173   :  { %v444_v49 = vadd.f32 0.5, %v443_v48  ;;  %v455_v54 = vmul.f32 %v1667_v52, %v437_v45  ;;  %v452_v60 = vmul.f32 0.5, %v1669_v56 }
 0x175   :  { %v454_v53 = vmul.f32 %v444_v49, %v2239_v9  ;;  %v453_v61 = vadd.f32 0.5, %v452_v60  ;;  %v461_v9 = vstv %s1636_s20 }
 0x176   :  { %v462_v1 = vmul.f32 %v461_v9, %v2227_v2 }
 0x177   :  { %v2282_v57 = vadd.f32 %v455_v54, %v454_v53 }
 0x178   :  { %v463_v20 = vadd.f32 %v462_v1, %v2233_v5 }
 0x179   :  { %1670 = vtanh.f32 %v2282_v57 }
 0x17f   :  { %v1671_v63 = vpop.eup %1670 }
 0x180   :  { %v458_v19 = vmul.f32 %v1671_v63, %v453_v61 }
 0x182   :  { %459 = vst [vmem:[#allocation2 + $0x1] sm:$0x1] %v458_v19  ;;  %544 = vmatmul.f32.vlgmr.msra.gmra.mxu0 %v458_v19  ;;  %564 = vmatmul.f32.vlgmr.msra.gmra.mxu1 %v458_v19 }
 0x183   :  { %584 = vmatmul.f32.vlgmr.msra.gmra.mxu2 %v458_v19  ;;  %604 = vmatmul.f32.vlgmr.msra.gmra.mxu3 %v458_v19 }
 0x1ff   :  { %v565_v15 = vpop.f32.mrf.mxu1  ;;  %v545_v24 = vpop.f32.mrf.mxu0 }
 0x200   :  { %v612_v8 = vrot.slane %v565_v15, 7 }
 0x202   :  { %v615_v25 = vsel %vm240_vm0, %v545_v24, %v612_v8  ;;  %v2404_v24 = vld [vmem:[#allocation9 + $0x1a0] sm:$0xff] }
 0x206   :  { %v585_v11 = vpop.f32.mrf.mxu2  ;;  %v605_v12 = vpop.f32.mrf.mxu3 }
 0x207   :  { %v613_v17 = vrot.slane %v585_v11, 6  ;;  %v614_v21 = vrot.slane %v605_v12, 5  ;;  %v2384_v11 = vld [vmem:[#allocation9 + $0x1e0] sm:$0xff]  ;;  %v2386_v12 = vld [vmem:[#allocation9 + $0x1e8] sm:$0xff] }
 0x208   :  { %900 = vmatpush.msra.mxu0 %v2384_v11  ;;  %920 = vmatpush.msra.mxu1 %v2386_v12 }
 0x209   :  { %v616_v28 = vsel %vm242_vm1, %v613_v17, %v614_v21  ;;  %v2392_v17 = vld [vmem:[#allocation9 + $0x1f8] sm:$0xff]  ;;  %v2398_v21 = vld [vmem:[#allocation9 + $0x1c8] sm:$0xff] }
 0x20a   :  { %v617_v29 = vsel %vm244_vm2, %v615_v25, %v616_v28  ;;  %960 = vmatpush.msra.mxu3 %v2392_v17  ;;  %921 = vmatpush.msra.mxu1 %v2398_v21  ;;  %v2406_v25 = vld [vmem:[#allocation9 + $0x1a8] sm:$0xff]  ;;  %v2412_v28 = vld [vmem:[#allocation9 + $0x180] sm:$0xff] }
 0x20b   :  { %v619_v32 = vadd.f32 %v617_v29, %v463_v20  ;;  %v2396_v20 = vld [vmem:[#allocation9 + $0x1c0] sm:$0xff]  ;;  %v2414_v29 = vld [vmem:[#allocation9 + $0x188] sm:$0xff] }
 0x20c   :  { %901 = vmatpush.msra.mxu0 %v2396_v20  ;;  %961 = vmatpush.msra.mxu3 %v2287_v23 }
 0x20d   :  { %v620_v33 = vmul.f32 0.5, %v619_v32  ;;  %v625_v36 = vrot.slane %v619_v32, 1  ;;  %v634_v40 = vrot.slane %v619_v32, 3  ;;  %v631_v41 = vrot.slane %v619_v32, 2  ;;  %922 = vmatpush.msra.mxu1 %v2406_v25  ;;  %v2420_v32 = vld [vmem:[#allocation9 + $0x160] sm:$0xff] }
 0x20e   :  { %902 = vmatpush.msra.mxu0 %v2404_v24  ;;  %962 = vmatpush.msra.mxu3 %v2293_v27 }
 0x20f   :  { %1672 = vtanh.f32 %v620_v33  ;;  %v627_v37 = vmul.f32 0.5, %v625_v36  ;;  %v636_v44 = vmul.f32 0.5, %v634_v40  ;;  %923 = vmatpush.msra.mxu1 %v2414_v29  ;;  %v2422_v33 = vld [vmem:[#allocation9 + $0x168] sm:$0xff]  ;;  %v2428_v36 = vld [vmem:[#allocation9 + $0x140] sm:$0xff] }
 0x210   :  { %903 = vmatpush.msra.mxu0 %v2412_v28  ;;  %963 = vmatpush.msra.mxu3 %v2299_v31  ;;  %v2436_v40 = vld [vmem:[#allocation9 + $0x120] sm:$0xff] }
 0x211   :  { %1674 = vtanh.f32 %v627_v37  ;;  %924 = vmatpush.msra.mxu1 %v2422_v33  ;;  %v2430_v37 = vld [vmem:[#allocation9 + $0x148] sm:$0xff] }
 0x212   :  { %1676 = vtanh.f32 %v631_v41  ;;  %904 = vmatpush.msra.mxu0 %v2420_v32  ;;  %964 = vmatpush.msra.mxu3 %v2305_v35  ;;  %v2438_v41 = vld [vmem:[#allocation9 + $0x128] sm:$0xff] }
 0x213   :  { %1678 = vtanh.f32 %v636_v44  ;;  %925 = vmatpush.msra.mxu1 %v2430_v37  ;;  %v2446_v44 = vld [vmem:[#allocation9 + $0x100] sm:$0xff] }
 0x214   :  { %905 = vmatpush.msra.mxu0 %v2428_v36  ;;  %965 = vmatpush.msra.mxu3 %v2311_v39 }
 0x215   :  { %v1673_v45 = vpop.eup %1672  ;;  %926 = vmatpush.msra.mxu1 %v2438_v41 }
 0x216   :  { %v622_v48 = vmul.f32 0.5, %v1673_v45  ;;  %906 = vmatpush.msra.mxu0 %v2436_v40  ;;  %966 = vmatpush.msra.mxu3 %v2317_v43  ;;  %v2448_v45 = vld [vmem:[#allocation9 + $0x108] sm:$0xff] }
 0x217   :  { %v1675_v49 = vpop.eup %1674  ;;  %927 = vmatpush.msra.mxu1 %v2448_v45 }
 0x218   :  { %v623_v52 = vadd.f32 0.5, %v622_v48  ;;  %v629_v53 = vmul.f32 0.5, %v1675_v49  ;;  %v1677_v56 = vpop.eup %1676  ;;  %907 = vmatpush.msra.mxu0 %v2446_v44  ;;  %967 = vmatpush.msra.mxu3 %v2323_v47  ;;  %v2454_v48 = vld [vmem:[#allocation9 + $0xe0] sm:$0xff]  ;;  %v2456_v49 = vld [vmem:[#allocation9 + $0xe8] sm:$0xff] }
 0x219   :  { %v1679_v63 = vpop.eup %1678  ;;  %928 = vmatpush.msra.mxu1 %v2456_v49 }
 0x21a   :  { %v630_v54 = vadd.f32 0.5, %v629_v53  ;;  %v641_v61 = vmul.f32 %v1677_v56, %v623_v52  ;;  %v638_v9 = vmul.f32 0.5, %v1679_v63  ;;  %908 = vmatpush.msra.mxu0 %v2454_v48  ;;  %968 = vmatpush.msra.mxu3 %v2329_v51  ;;  %v2462_v52 = vld [vmem:[#allocation9 + $0xc0] sm:$0xff]  ;;  %v2464_v53 = vld [vmem:[#allocation9 + $0xc8] sm:$0xff]  ;;  %v647_v63 = vstv %s2442_s21 }
 0x21b   :  { %929 = vmatpush.msra.mxu1 %v2464_v53  ;;  %v2470_v56 = vld [vmem:[#allocation9 + $0xa8] sm:$0xff] }
 0x21c   :  { %v640_v60 = vmul.f32 %v630_v54, %v2282_v57  ;;  %v639_v15 = vadd.f32 0.5, %v638_v9  ;;  %v2388_v57 = vld [vmem:[#allocation9 + $0x1f0] sm:$0xff]  ;;  %v2466_v54 = vld [vmem:[#allocation9 + $0xa0] sm:$0xff]  ;;  %909 = vmatpush.msra.mxu0 %v2462_v52  ;;  %2782 = vst [vmem:[#allocation26_spill] sm:$0xff] %v2470_v56  ;;  %969 = vmatpush.msra.mxu3 %v2335_v58 }
 0x21d   :  { %940 = vmatpush.msra.mxu2 %v2388_v57  ;;  %930 = vmatpush.msra.mxu1 %v2470_v56  ;;  %v2483_v9 = vld [vmem:[#allocation9 + $0x60] sm:$0xff]  ;;  %v2493_v56 = vld [vmem:[#allocation9 + $0x48] sm:$0xff] }
 0x21e   :  { %v2381_v19 = vadd.f32 %v641_v61, %v640_v60  ;;  %v2474_v60 = vld [vmem:[#allocation9 + $0x80] sm:$0xff]  ;;  %v2476_v61 = vld [vmem:[#allocation9 + $0x88] sm:$0xff]  ;;  %910 = vmatpush.msra.mxu0 %v2466_v54  ;;  %970 = vmatpush.msra.mxu3 %v2341_v62 }
 0x21f   :  { %941 = vmatpush.msra.mxu2 %v2285_v22  ;;  %2783 = vst [vmem:[#allocation27_spill] sm:$0xff] %v2474_v60  ;;  %931 = vmatpush.msra.mxu1 %v2476_v61 }
 0x220   :  { %1680 = vtanh.f32 %v2381_v19  ;;  %2784 = vst [vmem:[#allocation28_spill] sm:$0xff] %v2476_v61  ;;  %911 = vmatpush.msra.mxu0 %v2474_v60  ;;  %971 = vmatpush.msra.mxu3 %v2345_v4  ;;  %v2500_v61 = vld [vmem:[#allocation9 + $0x20] sm:$0xff]  ;;  %v2502_v60 = vld [vmem:[#allocation9 + $0x28] sm:$0xff] }
 0x221   :  { %942 = vmatpush.msra.mxu2 %v2291_v26 }
 0x222   :  { %912 = vmatpush.msra.mxu0 %v2483_v9  ;;  %972 = vmatpush.msra.mxu3 %v2351_v14 }
 0x223   :  { %943 = vmatpush.msra.mxu2 %v2297_v30 }
 0x224   :  { %973 = vmatpush.msra.mxu3 %v2357_v0 }
 0x225   :  { %944 = vmatpush.msra.mxu2 %v2303_v34 }
 0x226   :  { %v1681_v1 = vpop.eup %1680  ;;  %974 = vmatpush.msra.mxu3 %v2364_v7 }
 0x227   :  { %v644_v8 = vmul.f32 %v1681_v1, %v639_v15  ;;  %945 = vmatpush.msra.mxu2 %v2309_v38  ;;  %v2485_v15 = vld [vmem:[#allocation9 + $0x68] sm:$0xff] }
 0x228   :  { %2785 = vst [vmem:[#allocation29_spill] sm:$0xff] %v2485_v15  ;;  %932 = vmatpush.msra.mxu1 %v2485_v15  ;;  %975 = vmatpush.msra.mxu3 %v2370_v16 }
 0x229   :  { %645 = vst [vmem:[#allocation2 + $0x2] sm:$0x1] %v644_v8  ;;  %730 = vmatmul.f32.vlgmr.msrb.gmra.mxu0 %v644_v8  ;;  %750 = vmatmul.f32.vlgmr.msrb.gmra.mxu1 %v644_v8 }
 0x22a   :  { %770 = vmatmul.f32.vlgmr.msrb.gmra.mxu2 %v644_v8  ;;  %790 = vmatmul.f32.vlgmr.msrb.gmra.mxu3 %v644_v8  ;;  %v2491_v8 = vld [vmem:[#allocation9 + $0x40] sm:$0xff] }
 0x22b   :  { %946 = vmatpush.msra.mxu2 %v2315_v42  ;;  %913 = vmatpush.msra.mxu0 %v2491_v8 }
 0x22c   :  { %933 = vmatpush.msra.mxu1 %v2493_v56  ;;  %1146 = vmatpush.msrb.mxu3 %v2392_v17 }
 0x22d   :  { %947 = vmatpush.msra.mxu2 %v2321_v46  ;;  %914 = vmatpush.msra.mxu0 %v2500_v61 }
 0x22e   :  { %934 = vmatpush.msra.mxu1 %v2502_v60  ;;  %1147 = vmatpush.msrb.mxu3 %v2287_v23 }
 0x22f   :  { %948 = vmatpush.msra.mxu2 %v2327_v50 }
 0x230   :  { %1148 = vmatpush.msrb.mxu3 %v2293_v27 }
 0x231   :  { %949 = vmatpush.msra.mxu2 %v2333_v55 }
 0x232   :  { %1149 = vmatpush.msrb.mxu3 %v2299_v31 }
 0x233   :  { %950 = vmatpush.msra.mxu2 %v2337_v59  ;;  %v648_v59 = vmul.f32 %v647_v63, %v2227_v2  ;;  %v2508_v63 = vld [vmem:[#allocation9] sm:$0xff]  ;;  %v2510_v2 = vld [vmem:[#allocation9 + $0x8] sm:$0xff] }
 0x234   :  { %915 = vmatpush.msra.mxu0 %v2508_v63  ;;  %935 = vmatpush.msra.mxu1 %v2510_v2 }
 0x235   :  { %951 = vmatpush.msra.mxu2 %v2343_v3  ;;  %1150 = vmatpush.msrb.mxu3 %v2305_v35 }
 0x236   :  { %1086 = vmatpush.msrb.mxu0 %v2384_v11  ;;  %1106 = vmatpush.msrb.mxu1 %v2386_v12 }
 0x237   :  { %952 = vmatpush.msra.mxu2 %v2349_v10  ;;  %v649_v10 = vadd.f32 %v648_v59, %v2233_v5  ;;  %1151 = vmatpush.msrb.mxu3 %v2311_v39 }
 0x238   :  { %1087 = vmatpush.msrb.mxu0 %v2396_v20  ;;  %1107 = vmatpush.msrb.mxu1 %v2398_v21 }
 0x239   :  { %953 = vmatpush.msra.mxu2 %v2355_v18  ;;  %1152 = vmatpush.msrb.mxu3 %v2317_v43 }
 0x23a   :  { %1088 = vmatpush.msrb.mxu0 %v2404_v24  ;;  %1108 = vmatpush.msrb.mxu1 %v2406_v25 }
 0x23b   :  { %954 = vmatpush.msra.mxu2 %v2362_v6  ;;  %1153 = vmatpush.msrb.mxu3 %v2323_v47 }
 0x23c   :  { %1089 = vmatpush.msrb.mxu0 %v2412_v28  ;;  %1109 = vmatpush.msrb.mxu1 %v2414_v29 }
 0x23d   :  { %955 = vmatpush.msra.mxu2 %v2368_v13  ;;  %1154 = vmatpush.msrb.mxu3 %v2329_v51 }
 0x23e   :  { %1090 = vmatpush.msrb.mxu0 %v2420_v32  ;;  %1110 = vmatpush.msrb.mxu1 %v2422_v33 }
 0x23f   :  { %1126 = vmatpush.msrb.mxu2 %v2388_v57  ;;  %1155 = vmatpush.msrb.mxu3 %v2335_v58 }
 0x240   :  { %1091 = vmatpush.msrb.mxu0 %v2428_v36  ;;  %1111 = vmatpush.msrb.mxu1 %v2430_v37 }
 0x241   :  { %1127 = vmatpush.msrb.mxu2 %v2285_v22 }
 0x242   :  { %1092 = vmatpush.msrb.mxu0 %v2436_v40  ;;  %1112 = vmatpush.msrb.mxu1 %v2438_v41 }
 0x243   :  { %1128 = vmatpush.msrb.mxu2 %v2291_v26 }
 0x244   :  { %1093 = vmatpush.msrb.mxu0 %v2446_v44  ;;  %1113 = vmatpush.msrb.mxu1 %v2448_v45 }
 0x245   :  { %1129 = vmatpush.msrb.mxu2 %v2297_v30 }
 0x246   :  { %1094 = vmatpush.msrb.mxu0 %v2454_v48  ;;  %1114 = vmatpush.msrb.mxu1 %v2456_v49 }
 0x247   :  { %1130 = vmatpush.msrb.mxu2 %v2303_v34 }
 0x248   :  { %1095 = vmatpush.msrb.mxu0 %v2462_v52  ;;  %1115 = vmatpush.msrb.mxu1 %v2464_v53 }
 0x249   :  { %1131 = vmatpush.msrb.mxu2 %v2309_v38 }
 0x24a   :  { %1096 = vmatpush.msrb.mxu0 %v2466_v54 }
 0x24b   :  { %1132 = vmatpush.msrb.mxu2 %v2315_v42 }
 0x24d   :  { %1133 = vmatpush.msrb.mxu2 %v2321_v46 }
 0x24f   :  { %1134 = vmatpush.msrb.mxu2 %v2327_v50 }
 0x251   :  { %1135 = vmatpush.msrb.mxu2 %v2333_v55 }
 0x2a6   :  { %v751_v1 = vpop.f32.mrf.mxu1 }
 0x2a7   :  { %v798_v3 = vrot.slane %v751_v1, 7  ;;  %v731_v1 = vpop.f32.mrf.mxu0 }
 0x2a9   :  { %v801_v18 = vsel %vm240_vm0, %v731_v1, %v798_v3 }
 0x2ad   :  { %v771_v4 = vpop.f32.mrf.mxu2  ;;  %v791_v62 = vpop.f32.mrf.mxu3 }
 0x2ae   :  { %v799_v14 = vrot.slane %v771_v4, 6  ;;  %v800_v15 = vrot.slane %v791_v62, 5 }
 0x2b0   :  { %v802_v0 = vsel %vm242_vm1, %v799_v14, %v800_v15 }
 0x2b1   :  { %v803_v5 = vsel %vm244_vm2, %v801_v18, %v802_v0 }
 0x2b2   :  { %v805_v59 = vadd.f32 %v803_v5, %v649_v10 }
 0x2b4   :  { %v806_v62 = vmul.f32 0.5, %v805_v59  ;;  %v811_v3 = vrot.slane %v805_v59, 1  ;;  %v820_v10 = vrot.slane %v805_v59, 3  ;;  %v817_v14 = vrot.slane %v805_v59, 2 }
 0x2b6   :  { %1682 = vtanh.f32 %v806_v62  ;;  %v813_v4 = vmul.f32 0.5, %v811_v3  ;;  %v822_v18 = vmul.f32 0.5, %v820_v10 }
 0x2b8   :  { %1684 = vtanh.f32 %v813_v4 }
 0x2b9   :  { %1686 = vtanh.f32 %v817_v14 }
 0x2ba   :  { %1688 = vtanh.f32 %v822_v18 }
 0x2bc   :  { %v1683_v0 = vpop.eup %1682 }
 0x2bd   :  { %v808_v15 = vmul.f32 0.5, %v1683_v0  ;;  %v2787_v0 = vld [vmem:[#allocation26_spill] sm:$0xff] }
 0x2be   :  { %v1685_v1 = vpop.eup %1684  ;;  %1116 = vmatpush.msrb.mxu1 %v2787_v0 }
 0x2bf   :  { %v809_v5 = vadd.f32 0.5, %v808_v15  ;;  %v815_v59 = vmul.f32 0.5, %v1685_v1  ;;  %v1687_v3 = vpop.eup %1686  ;;  %v2789_v15 = vld [vmem:[#allocation19_spill] sm:$0xff] }
 0x2c0   :  { %v1689_v14 = vpop.eup %1688  ;;  %1156 = vmatpush.msrb.mxu3 %v2789_v15 }
 0x2c1   :  { %v816_v62 = vadd.f32 0.5, %v815_v59  ;;  %v827_v10 = vmul.f32 %v1687_v3, %v809_v5  ;;  %v824_v1 = vmul.f32 0.5, %v1689_v14  ;;  %v2790_v5 = vld [vmem:[#allocation27_spill] sm:$0xff]  ;;  %v2791_v59 = vld [vmem:[#allocation28_spill] sm:$0xff]  ;;  %v2793_v3 = vld [vmem:[#allocation21_spill] sm:$0xff] }
 0x2c2   :  { %1097 = vmatpush.msrb.mxu0 %v2790_v5  ;;  %1117 = vmatpush.msrb.mxu1 %v2791_v59  ;;  %v2797_v5 = vld [vmem:[#allocation24_spill] sm:$0xff]  ;;  %v2798_v59 = vld [vmem:[#allocation25_spill] sm:$0xff] }
 0x2c3   :  { %v826_v4 = vmul.f32 %v816_v62, %v2381_v19  ;;  %v2788_v19 = vld [vmem:[#allocation18_spill] sm:$0xff]  ;;  %v2792_v62 = vld [vmem:[#allocation20_spill] sm:$0xff]  ;;  %1157 = vmatpush.msrb.mxu3 %v2793_v3 }
 0x2c4   :  { %1136 = vmatpush.msrb.mxu2 %v2788_v19  ;;  %1098 = vmatpush.msrb.mxu0 %v2483_v9  ;;  %v825_v19 = vadd.f32 0.5, %v824_v1 }
 0x2c5   :  { %v2563_v18 = vadd.f32 %v827_v10, %v826_v4  ;;  %v2794_v4 = vld [vmem:[#allocation29_spill] sm:$0xff]  ;;  %v2795_v10 = vld [vmem:[#allocation22_spill] sm:$0xff] }
 0x2c6   :  { %1137 = vmatpush.msrb.mxu2 %v2792_v62  ;;  %1118 = vmatpush.msrb.mxu1 %v2794_v4 }
 0x2c7   :  { %2786 = vst [vmem:[#allocation30_spill] sm:$0xff] %v2563_v18  ;;  %1690 = vtanh.f32 %v2563_v18  ;;  %v2796_v18 = vld [vmem:[#allocation23_spill] sm:$0xff]  ;;  %1099 = vmatpush.msrb.mxu0 %v2491_v8 }
 0x2c8   :  { %1138 = vmatpush.msrb.mxu2 %v2795_v10  ;;  %1158 = vmatpush.msrb.mxu3 %v2796_v18 }
 0x2c9   :  { %1119 = vmatpush.msrb.mxu1 %v2493_v56  ;;  %1100 = vmatpush.msrb.mxu0 %v2500_v61 }
 0x2ca   :  { %1139 = vmatpush.msrb.mxu2 %v2797_v5  ;;  %1159 = vmatpush.msrb.mxu3 %v2798_v59 }
 0x2cb   :  { %1120 = vmatpush.msrb.mxu1 %v2502_v60  ;;  %1101 = vmatpush.msrb.mxu0 %v2508_v63 }
 0x2cc   :  { %1140 = vmatpush.msrb.mxu2 %v2362_v6  ;;  %1160 = vmatpush.msrb.mxu3 %v2364_v7 }
 0x2cd   :  { %v1691_v14 = vpop.eup %1690  ;;  %1121 = vmatpush.msrb.mxu1 %v2510_v2 }
 0x2ce   :  { %v830_v62 = vmul.f32 %v1691_v14, %v825_v19  ;;  %1141 = vmatpush.msrb.mxu2 %v2368_v13  ;;  %1161 = vmatpush.msrb.mxu3 %v2370_v16 }
 0x2d0   :  { %831 = vst [vmem:[#allocation2 + $0x3] sm:$0x1] %v830_v62  ;;  %916 = vmatmul.f32.vlgmr.msra.gmra.mxu0 %v830_v62  ;;  %936 = vmatmul.f32.vlgmr.msra.gmra.mxu1 %v830_v62 }
 0x2d1   :  { %956 = vmatmul.f32.vlgmr.msra.gmra.mxu2 %v830_v62  ;;  %976 = vmatmul.f32.vlgmr.msra.gmra.mxu3 %v830_v62 }
 0x2d2   :  { %1272 = vmatpush.msra.mxu0 %v2384_v11  ;;  %1292 = vmatpush.msra.mxu1 %v2386_v12 }
 0x2d3   :  { %1312 = vmatpush.msra.mxu2 %v2388_v57  ;;  %1332 = vmatpush.msra.mxu3 %v2392_v17 }
 0x2d4   :  { %1273 = vmatpush.msra.mxu0 %v2396_v20  ;;  %1293 = vmatpush.msra.mxu1 %v2398_v21 }
 0x2d5   :  { %1313 = vmatpush.msra.mxu2 %v2285_v22  ;;  %1333 = vmatpush.msra.mxu3 %v2287_v23  ;;  %v2799_v22 = vld [vmem:[#allocation18_spill] sm:$0xff]  ;;  %v2800_v23 = vld [vmem:[#allocation27_spill] sm:$0xff] }
 0x2d6   :  { %1274 = vmatpush.msra.mxu0 %v2404_v24  ;;  %1294 = vmatpush.msra.mxu1 %v2406_v25 }
 0x2d7   :  { %1314 = vmatpush.msra.mxu2 %v2291_v26  ;;  %1334 = vmatpush.msra.mxu3 %v2293_v27  ;;  %v2801_v26 = vld [vmem:[#allocation28_spill] sm:$0xff] }
 0x2d8   :  { %1275 = vmatpush.msra.mxu0 %v2412_v28  ;;  %1295 = vmatpush.msra.mxu1 %v2414_v29  ;;  %v2802_v27 = vld [vmem:[#allocation20_spill] sm:$0xff] }
 0x2d9   :  { %1315 = vmatpush.msra.mxu2 %v2297_v30  ;;  %1335 = vmatpush.msra.mxu3 %v2299_v31  ;;  %v833_v30 = vstv %s1638_s22 }
 0x2da   :  { %1276 = vmatpush.msra.mxu0 %v2420_v32  ;;  %1296 = vmatpush.msra.mxu1 %v2422_v33 }
 0x2db   :  { %1316 = vmatpush.msra.mxu2 %v2303_v34  ;;  %1336 = vmatpush.msra.mxu3 %v2305_v35  ;;  %v2803_v34 = vld [vmem:[#allocation17_spill] sm:$0xff] }
 0x2dc   :  { %1277 = vmatpush.msra.mxu0 %v2428_v36  ;;  %1297 = vmatpush.msra.mxu1 %v2430_v37  ;;  %v834_v35 = vmul.f32 %v833_v30, %v2803_v34 }
 0x2dd   :  { %1317 = vmatpush.msra.mxu2 %v2309_v38  ;;  %1337 = vmatpush.msra.mxu3 %v2311_v39 }
 0x2de   :  { %1278 = vmatpush.msra.mxu0 %v2436_v40  ;;  %1298 = vmatpush.msra.mxu1 %v2438_v41 }
 0x2df   :  { %1318 = vmatpush.msra.mxu2 %v2315_v42  ;;  %1338 = vmatpush.msra.mxu3 %v2317_v43 }
 0x2e0   :  { %1279 = vmatpush.msra.mxu0 %v2446_v44  ;;  %1299 = vmatpush.msra.mxu1 %v2448_v45 }
 0x2e1   :  { %1319 = vmatpush.msra.mxu2 %v2321_v46  ;;  %1339 = vmatpush.msra.mxu3 %v2323_v47  ;;  %v2660_v46 = vld [vmem:[%s2739_s3] sm:$0xf]  ;;  %s1639_s3 = sld [smem:[#allocation4 + $0x5]] }
 0x2e2   :  { %1280 = vmatpush.msra.mxu0 %v2454_v48  ;;  %1300 = vmatpush.msra.mxu1 %v2456_v49  ;;  %v835_v47 = vadd.f32 %v2660_v46, %v834_v35 }
 0x2e3   :  { %1320 = vmatpush.msra.mxu2 %v2327_v50  ;;  %1340 = vmatpush.msra.mxu3 %v2329_v51 }
 0x2e4   :  { %1281 = vmatpush.msra.mxu0 %v2462_v52  ;;  %1301 = vmatpush.msra.mxu1 %v2464_v53 }
 0x2e5   :  { %1321 = vmatpush.msra.mxu2 %v2333_v55  ;;  %1341 = vmatpush.msra.mxu3 %v2335_v58 }
 0x2e6   :  { %1282 = vmatpush.msra.mxu0 %v2466_v54  ;;  %1302 = vmatpush.msra.mxu1 %v2787_v0 }
 0x2e7   :  { %1322 = vmatpush.msra.mxu2 %v2799_v22  ;;  %1342 = vmatpush.msra.mxu3 %v2789_v15 }
 0x2e8   :  { %1283 = vmatpush.msra.mxu0 %v2800_v23  ;;  %1303 = vmatpush.msra.mxu1 %v2801_v26 }
 0x2e9   :  { %1323 = vmatpush.msra.mxu2 %v2802_v27  ;;  %1343 = vmatpush.msra.mxu3 %v2793_v3  ;;  %v2804_v27 = vld [vmem:[#allocation30_spill] sm:$0xff] }
 0x2ea   :  { %1284 = vmatpush.msra.mxu0 %v2483_v9  ;;  %1304 = vmatpush.msra.mxu1 %v2794_v4 }
 0x2eb   :  { %1324 = vmatpush.msra.mxu2 %v2795_v10  ;;  %1344 = vmatpush.msra.mxu3 %v2796_v18 }
 0x2ec   :  { %1285 = vmatpush.msra.mxu0 %v2491_v8  ;;  %1305 = vmatpush.msra.mxu1 %v2493_v56 }
 0x2ed   :  { %1325 = vmatpush.msra.mxu2 %v2797_v5  ;;  %1345 = vmatpush.msra.mxu3 %v2798_v59 }
 0x2ee   :  { %1286 = vmatpush.msra.mxu0 %v2500_v61  ;;  %1306 = vmatpush.msra.mxu1 %v2502_v60 }
 0x2ef   :  { %1326 = vmatpush.msra.mxu2 %v2362_v6  ;;  %1346 = vmatpush.msra.mxu3 %v2364_v7 }
 0x2f0   :  { %1287 = vmatpush.msra.mxu0 %v2508_v63  ;;  %1307 = vmatpush.msra.mxu1 %v2510_v2 }
 0x2f1   :  { %1327 = vmatpush.msra.mxu2 %v2368_v13  ;;  %1347 = vmatpush.msra.mxu3 %v2370_v16 }
 0x34d   :  { %v937_v31 = vpop.f32.mrf.mxu1  ;;  %v917_v51 = vpop.f32.mrf.mxu0 }
 0x34e   :  { %v984_v38 = vrot.slane %v937_v31, 7 }
 0x350   :  { %v987_v55 = vsel %vm240_vm0, %v917_v51, %v984_v38  ;;  %v1452_v51 = vld [vmem:[#allocation9 + $0x1d0] sm:$0xff] }
 0x354   :  { %v957_v39 = vpop.f32.mrf.mxu2  ;;  %v977_v42 = vpop.f32.mrf.mxu3 }
 0x355   :  { %v985_v43 = vrot.slane %v957_v39, 6  ;;  %v986_v50 = vrot.slane %v977_v42, 5 }
 0x357   :  { %v988_v58 = vsel %vm242_vm1, %v985_v43, %v986_v50 }
 0x358   :  { %v989_v6 = vsel %vm244_vm2, %v987_v55, %v988_v58  ;;  %v1453_v55 = vld [vmem:[#allocation9 + $0x1d8] sm:$0xff]  ;;  %v1448_v58 = vld [vmem:[#allocation9 + $0x1b0] sm:$0xff] }
 0x359   :  { %v991_v7 = vadd.f32 %v989_v6, %v835_v47  ;;  %v1449_v6 = vld [vmem:[#allocation9 + $0x1b8] sm:$0xff] }
 0x35b   :  { %v992_v13 = vmul.f32 0.5, %v991_v7  ;;  %v997_v16 = vrot.slane %v991_v7, 1  ;;  %v1006_v19 = vrot.slane %v991_v7, 3  ;;  %v1003_v15 = vrot.slane %v991_v7, 2  ;;  %v1444_v7 = vld [vmem:[#allocation9 + $0x190] sm:$0xff] }
 0x35d   :  { %1692 = vtanh.f32 %v992_v13  ;;  %v999_v18 = vmul.f32 0.5, %v997_v16  ;;  %v1008_v1 = vmul.f32 0.5, %v1006_v19  ;;  %v1445_v13 = vld [vmem:[#allocation9 + $0x198] sm:$0xff]  ;;  %v1440_v16 = vld [vmem:[#allocation9 + $0x170] sm:$0xff] }
 0x35e   :  { %v1436_v19 = vld [vmem:[#allocation9 + $0x150] sm:$0xff] }
 0x35f   :  { %1694 = vtanh.f32 %v999_v18  ;;  %v1441_v18 = vld [vmem:[#allocation9 + $0x178] sm:$0xff] }
 0x360   :  { %1696 = vtanh.f32 %v1003_v15  ;;  %v1437_v15 = vld [vmem:[#allocation9 + $0x158] sm:$0xff] }
 0x361   :  { %1698 = vtanh.f32 %v1008_v1  ;;  %v1432_v1 = vld [vmem:[#allocation9 + $0x130] sm:$0xff] }
 0x363   :  { %v1693_v5 = vpop.eup %1692 }
 0x364   :  { %v994_v59 = vmul.f32 0.5, %v1693_v5  ;;  %v1433_v5 = vld [vmem:[#allocation9 + $0x138] sm:$0xff] }
 0x365   :  { %v1695_v62 = vpop.eup %1694 }
 0x366   :  { %v995_v3 = vadd.f32 0.5, %v994_v59  ;;  %v1001_v10 = vmul.f32 0.5, %v1695_v62  ;;  %v1697_v22 = vpop.eup %1696  ;;  %v1428_v59 = vld [vmem:[#allocation9 + $0x110] sm:$0xff]  ;;  %v1429_v62 = vld [vmem:[#allocation9 + $0x118] sm:$0xff] }
 0x367   :  { %v1699_v34 = vpop.eup %1698 }
 0x368   :  { %v1002_v14 = vadd.f32 0.5, %v1001_v10  ;;  %v1013_v31 = vmul.f32 %v1697_v22, %v995_v3  ;;  %v1010_v38 = vmul.f32 0.5, %v1699_v34  ;;  %v1424_v3 = vld [vmem:[#allocation9 + $0xf0] sm:$0xff]  ;;  %v1425_v10 = vld [vmem:[#allocation9 + $0xf8] sm:$0xff] }
 0x369   :  { %v1421_v22 = vld [vmem:[#allocation9 + $0xd8] sm:$0xff] }
 0x36a   :  { %v1012_v30 = vmul.f32 %v1002_v14, %v2804_v27  ;;  %v1011_v39 = vadd.f32 0.5, %v1010_v38  ;;  %v1420_v14 = vld [vmem:[#allocation9 + $0xd0] sm:$0xff]  ;;  %v1413_v34 = vld [vmem:[#allocation9 + $0x98] sm:$0xff] }
 0x36b   :  { %v1416_v27 = vld [vmem:[#allocation9 + $0xb0] sm:$0xff] }
 0x36c   :  { %v2667_v35 = vadd.f32 %v1013_v31, %v1012_v30  ;;  %v1417_v30 = vld [vmem:[#allocation9 + $0xb8] sm:$0xff]  ;;  %v1412_v31 = vld [vmem:[#allocation9 + $0x90] sm:$0xff] }
 0x36d   :  { %v1408_v38 = vld [vmem:[#allocation9 + $0x70] sm:$0xff] }
 0x36e   :  { %1700 = vtanh.f32 %v2667_v35 }
 0x374   :  { %v1701_v42 = vpop.eup %1700 }
 0x375   :  { %v1016_v43 = vmul.f32 %v1701_v42, %v1011_v39  ;;  %v1409_v39 = vld [vmem:[#allocation9 + $0x78] sm:$0xff] }
 0x377   :  { %1017 = vst [vmem:[#allocation2 + $0x4] sm:$0x1] %v1016_v43  ;;  %1102 = vmatmul.f32.vlgmr.msrb.gmra.mxu0 %v1016_v43  ;;  %1122 = vmatmul.f32.vlgmr.msrb.gmra.mxu1 %v1016_v43 }
 0x378   :  { %1142 = vmatmul.f32.vlgmr.msrb.gmra.mxu2 %v1016_v43  ;;  %1162 = vmatmul.f32.vlgmr.msrb.gmra.mxu3 %v1016_v43  ;;  %v1404_v43 = vld [vmem:[#allocation9 + $0x50] sm:$0xff] }
 0x379   :  { %1458 = vmatpush.msrb.mxu0 %v2384_v11  ;;  %1478 = vmatpush.msrb.mxu1 %v2386_v12  ;;  %v1019_v11 = vstv %s1639_s3 }
 0x37a   :  { %1498 = vmatpush.msrb.mxu2 %v2388_v57  ;;  %1518 = vmatpush.msrb.mxu3 %v2392_v17  ;;  %v2704_v57 = vld [vmem:[#allocation8] sm:$0xf] }
 0x37b   :  { %1459 = vmatpush.msrb.mxu0 %v2396_v20  ;;  %1479 = vmatpush.msrb.mxu1 %v2398_v21  ;;  %v1020_v17 = vmul.f32 %v2704_v57, %v1019_v11  ;;  %v1405_v11 = vld [vmem:[#allocation9 + $0x58] sm:$0xff] }
 0x37c   :  { %1499 = vmatpush.msrb.mxu2 %v1452_v51  ;;  %1519 = vmatpush.msrb.mxu3 %v1453_v55 }
 0x37d   :  { %1460 = vmatpush.msrb.mxu0 %v2404_v24  ;;  %1480 = vmatpush.msrb.mxu1 %v2406_v25 }
 0x37e   :  { %1500 = vmatpush.msrb.mxu2 %v1448_v58  ;;  %1520 = vmatpush.msrb.mxu3 %v1449_v6 }
 0x37f   :  { %1461 = vmatpush.msrb.mxu0 %v2412_v28  ;;  %1481 = vmatpush.msrb.mxu1 %v2414_v29  ;;  %v1021_v28 = vadd.f32 %v2660_v46, %v1020_v17  ;;  %v1400_v17 = vld [vmem:[#allocation9 + $0x30] sm:$0xff] }
 0x380   :  { %1501 = vmatpush.msrb.mxu2 %v1444_v7  ;;  %1521 = vmatpush.msrb.mxu3 %v1445_v13  ;;  %v1592_v7 = vld [vmem:[#allocation11 + $0x78] sm:$0xff]  ;;  %v1591_v13 = vld [vmem:[#allocation11 + $0x70] sm:$0xff] }
 0x381   :  { %1462 = vmatpush.msrb.mxu0 %v2420_v32  ;;  %1482 = vmatpush.msrb.mxu1 %v2422_v33 }
 0x382   :  { %1502 = vmatpush.msrb.mxu2 %v1440_v16  ;;  %1522 = vmatpush.msrb.mxu3 %v1441_v18  ;;  %v1589_v16 = vld [vmem:[#allocation11 + $0x60] sm:$0xff]  ;;  %v1588_v18 = vld [vmem:[#allocation11 + $0x58] sm:$0xff] }
 0x383   :  { %1463 = vmatpush.msrb.mxu0 %v2428_v36  ;;  %1483 = vmatpush.msrb.mxu1 %v2430_v37 }
 0x384   :  { %1503 = vmatpush.msrb.mxu2 %v1436_v19  ;;  %1523 = vmatpush.msrb.mxu3 %v1437_v15  ;;  %v1587_v19 = vld [vmem:[#allocation11 + $0x50] sm:$0xff]  ;;  %v1586_v15 = vld [vmem:[#allocation11 + $0x48] sm:$0xff] }
 0x385   :  { %1464 = vmatpush.msrb.mxu0 %v2436_v40  ;;  %1484 = vmatpush.msrb.mxu1 %v2438_v41 }
 0x386   :  { %1504 = vmatpush.msrb.mxu2 %v1432_v1  ;;  %1524 = vmatpush.msrb.mxu3 %v1433_v5  ;;  %v1391_v1 = vstv %s1641_s26  ;;  %v1585_v5 = vld [vmem:[#allocation11 + $0x40] sm:$0xff] }
 0x387   :  { %1465 = vmatpush.msrb.mxu0 %v2446_v44  ;;  %1485 = vmatpush.msrb.mxu1 %v2448_v45 }
 0x388   :  { %1505 = vmatpush.msrb.mxu2 %v1428_v59  ;;  %1525 = vmatpush.msrb.mxu3 %v1429_v62  ;;  %v1584_v62 = vld [vmem:[#allocation11 + $0x38] sm:$0xff] }
 0x389   :  { %1466 = vmatpush.msrb.mxu0 %v2454_v48  ;;  %1486 = vmatpush.msrb.mxu1 %v2456_v49 }
 0x38a   :  { %1506 = vmatpush.msrb.mxu2 %v1424_v3  ;;  %1526 = vmatpush.msrb.mxu3 %v1425_v10  ;;  %v1392_v3 = vmul.f32 %v2704_v57, %v1391_v1  ;;  %v1583_v10 = vld [vmem:[#allocation11 + $0x30] sm:$0xff] }
 0x38b   :  { %1467 = vmatpush.msrb.mxu0 %v2462_v52  ;;  %1487 = vmatpush.msrb.mxu1 %v2464_v53 }
 0x38c   :  { %1507 = vmatpush.msrb.mxu2 %v1420_v14  ;;  %1527 = vmatpush.msrb.mxu3 %v1421_v22 }
 0x38d   :  { %1468 = vmatpush.msrb.mxu0 %v2466_v54  ;;  %1488 = vmatpush.msrb.mxu1 %v2787_v0 }
 0x38e   :  { %1508 = vmatpush.msrb.mxu2 %v1416_v27  ;;  %1528 = vmatpush.msrb.mxu3 %v1417_v30  ;;  %v1582_v30 = vld [vmem:[#allocation11 + $0x28] sm:$0xff] }
 0x38f   :  { %1469 = vmatpush.msrb.mxu0 %v2800_v23  ;;  %1489 = vmatpush.msrb.mxu1 %v2801_v26 }
 0x390   :  { %1509 = vmatpush.msrb.mxu2 %v1412_v31  ;;  %1529 = vmatpush.msrb.mxu3 %v1413_v34  ;;  %v1393_v34 = vadd.f32 %v2660_v46, %v1392_v3 }
 0x391   :  { %1470 = vmatpush.msrb.mxu0 %v2483_v9  ;;  %1490 = vmatpush.msrb.mxu1 %v2794_v4 }
 0x392   :  { %1510 = vmatpush.msrb.mxu2 %v1408_v38  ;;  %1530 = vmatpush.msrb.mxu3 %v1409_v39  ;;  %v1581_v39 = vld [vmem:[#allocation11 + $0x20] sm:$0xff] }
 0x393   :  { %1471 = vmatpush.msrb.mxu0 %v2491_v8  ;;  %1491 = vmatpush.msrb.mxu1 %v2493_v56 }
 0x394   :  { %1511 = vmatpush.msrb.mxu2 %v1404_v43  ;;  %1531 = vmatpush.msrb.mxu3 %v1405_v11 }
 0x395   :  { %1472 = vmatpush.msrb.mxu0 %v2500_v61  ;;  %1492 = vmatpush.msrb.mxu1 %v2502_v60 }
 0x396   :  { %1512 = vmatpush.msrb.mxu2 %v1400_v17 }
 0x397   :  { %1473 = vmatpush.msrb.mxu0 %v2508_v63  ;;  %1493 = vmatpush.msrb.mxu1 %v2510_v2 }
 0x3f4   :  { %v1123_v12 = vpop.f32.mrf.mxu1  ;;  %v1103_v32 = vpop.f32.mrf.mxu0 }
 0x3f5   :  { %v1170_v20 = vrot.slane %v1123_v12, 7 }
 0x3f7   :  { %v1173_v33 = vsel %vm240_vm0, %v1103_v32, %v1170_v20  ;;  %v1401_v20 = vld [vmem:[#allocation9 + $0x38] sm:$0xff] }
 0x3f8   :  { %1532 = vmatpush.msrb.mxu3 %v1401_v20  ;;  %v1578_v20 = vld [vmem:[#allocation11 + $0x8] sm:$0xff] }
 0x3fb   :  { %v1143_v21 = vpop.f32.mrf.mxu2  ;;  %v1163_v24 = vpop.f32.mrf.mxu3 }
 0x3fc   :  { %v1171_v25 = vrot.slane %v1143_v21, 6  ;;  %v1172_v29 = vrot.slane %v1163_v24, 5 }
 0x3fe   :  { %v1174_v36 = vsel %vm242_vm1, %v1171_v25, %v1172_v29  ;;  %v1397_v29 = vld [vmem:[#allocation9 + $0x18] sm:$0xff] }
 0x3ff   :  { %v1175_v2 = vsel %vm244_vm2, %v1173_v33, %v1174_v36  ;;  %1533 = vmatpush.msrb.mxu3 %v1397_v29 }
 0x400   :  { %v1177_v37 = vadd.f32 %v1175_v2, %v1021_v28  ;;  %v1396_v28 = vld [vmem:[#allocation9 + $0x10] sm:$0xff] }
 0x401   :  { %1513 = vmatpush.msrb.mxu2 %v1396_v28 }
 0x402   :  { %v1178_v40 = vmul.f32 0.5, %v1177_v37  ;;  %v1183_v41 = vrot.slane %v1177_v37, 1  ;;  %v1192_v45 = vrot.slane %v1177_v37, 3  ;;  %v1189_v48 = vrot.slane %v1177_v37, 2 }
 0x404   :  { %1702 = vtanh.f32 %v1178_v40  ;;  %v1185_v44 = vmul.f32 0.5, %v1183_v41  ;;  %v1194_v49 = vmul.f32 0.5, %v1192_v45 }
 0x406   :  { %1704 = vtanh.f32 %v1185_v44 }
 0x407   :  { %1706 = vtanh.f32 %v1189_v48 }
 0x408   :  { %1708 = vtanh.f32 %v1194_v49 }
 0x40a   :  { %v1703_v52 = vpop.eup %1702 }
 0x40b   :  { %v1180_v53 = vmul.f32 0.5, %v1703_v52 }
 0x40c   :  { %v1705_v54 = vpop.eup %1704 }
 0x40d   :  { %v1181_v56 = vadd.f32 0.5, %v1180_v53  ;;  %v1187_v60 = vmul.f32 0.5, %v1705_v54  ;;  %v1707_v9 = vpop.eup %1706 }
 0x40e   :  { %v1709_v0 = vpop.eup %1708 }
 0x40f   :  { %v1188_v61 = vadd.f32 0.5, %v1187_v60  ;;  %v1199_v63 = vmul.f32 %v1707_v9, %v1181_v56  ;;  %v1196_v23 = vmul.f32 0.5, %v1709_v0 }
 0x411   :  { %v1198_v8 = vmul.f32 %v1188_v61, %v2667_v35  ;;  %v1197_v26 = vadd.f32 0.5, %v1196_v23  ;;  %v1205_v35 = vstv %s1640_s25 }
 0x412   :  { %v1206_v12 = vmul.f32 %v2704_v57, %v1205_v35  ;;  %v1580_v57 = vld [vmem:[#allocation11 + $0x18] sm:$0xff] }
 0x413   :  { %v2712_v4 = vadd.f32 %v1199_v63, %v1198_v8 }
 0x414   :  { %v1207_v33 = vadd.f32 %v2660_v46, %v1206_v12  ;;  %v1579_v12 = vld [vmem:[#allocation11 + $0x10] sm:$0xff]  ;;  %v1577_v46 = vld [vmem:[#allocation11] sm:$0xff] }
 0x415   :  { %1710 = vtanh.f32 %v2712_v4 }
 0x41b   :  { %v1711_v47 = vpop.eup %1710 }
 0x41c   :  { %v1202_v50 = vmul.f32 %v1711_v47, %v1197_v26 }
 0x41e   :  { %1203 = vst [vmem:[#allocation2 + $0x5] sm:$0x1] %v1202_v50  ;;  %1288 = vmatmul.f32.vlgmr.msra.gmra.mxu0 %v1202_v50  ;;  %1308 = vmatmul.f32.vlgmr.msra.gmra.mxu1 %v1202_v50 }
 0x41f   :  { %1328 = vmatmul.f32.vlgmr.msra.gmra.mxu2 %v1202_v50  ;;  %1348 = vmatmul.f32.vlgmr.msra.gmra.mxu3 %v1202_v50 }
 0x420   :  { %1595 = vmatpush.msra.mxu0 %v1592_v7 }
 0x422   :  { %1596 = vmatpush.msra.mxu0 %v1591_v13 }
 0x49b   :  { %v1309_v42 = vpop.f32.mrf.mxu1  ;;  %v1289_v2 = vpop.f32.mrf.mxu0 }
 0x49c   :  { %v1356_v21 = vrot.slane %v1309_v42, 7 }
 0x49e   :  { %v1359_v37 = vsel %vm240_vm0, %v1289_v2, %v1356_v21 }
 0x4a2   :  { %v1329_v24 = vpop.f32.mrf.mxu2  ;;  %v1349_v25 = vpop.f32.mrf.mxu3 }
 0x4a3   :  { %v1357_v32 = vrot.slane %v1329_v24, 6  ;;  %v1358_v36 = vrot.slane %v1349_v25, 5 }
 0x4a5   :  { %v1360_v40 = vsel %vm242_vm1, %v1357_v32, %v1358_v36 }
 0x4a6   :  { %v1361_v41 = vsel %vm244_vm2, %v1359_v37, %v1360_v40 }
 0x4a7   :  { %v1363_v44 = vadd.f32 %v1361_v41, %v1207_v33 }
 0x4a9   :  { %v1364_v45 = vmul.f32 0.5, %v1363_v44  ;;  %v1369_v48 = vrot.slane %v1363_v44, 1  ;;  %v1378_v52 = vrot.slane %v1363_v44, 3  ;;  %v1375_v53 = vrot.slane %v1363_v44, 2 }
 0x4ab   :  { %1712 = vtanh.f32 %v1364_v45  ;;  %v1371_v49 = vmul.f32 0.5, %v1369_v48  ;;  %v1380_v54 = vmul.f32 0.5, %v1378_v52 }
 0x4ad   :  { %1714 = vtanh.f32 %v1371_v49 }
 0x4ae   :  { %1716 = vtanh.f32 %v1375_v53 }
 0x4af   :  { %1718 = vtanh.f32 %v1380_v54 }
 0x4b1   :  { %v1713_v56 = vpop.eup %1712 }
 0x4b2   :  { %v1366_v60 = vmul.f32 0.5, %v1713_v56 }
 0x4b3   :  { %v1715_v61 = vpop.eup %1714 }
 0x4b4   :  { %v1367_v9 = vadd.f32 0.5, %v1366_v60  ;;  %v1373_v8 = vmul.f32 0.5, %v1715_v61  ;;  %v1717_v0 = vpop.eup %1716 }
 0x4b5   :  { %v1719_v47 = vpop.eup %1718 }
 0x4b6   :  { %v1374_v63 = vadd.f32 0.5, %v1373_v8  ;;  %v1385_v26 = vmul.f32 %v1717_v0, %v1367_v9  ;;  %v1382_v51 = vmul.f32 0.5, %v1719_v47  ;;  %v1594_v9 = vstv %s2741_s5 }
 0x4b8   :  { %v1384_v23 = vmul.f32 %v1374_v63, %v2712_v4  ;;  %v1383_v55 = vadd.f32 0.5, %v1382_v51  ;;  %v1590_v4 = vld [vmem:[#allocation11 + $0x68] sm:$0xff] }
 0x4b9   :  { %1597 = vmatpush.msra.mxu0 %v1590_v4 }
 0x4ba   :  { %v2721_v50 = vadd.f32 %v1385_v26, %v1384_v23 }
 0x4bb   :  { %1598 = vmatpush.msra.mxu0 %v1589_v16 }
 0x4bc   :  { %1720 = vtanh.f32 %v2721_v50 }
 0x4bd   :  { %1599 = vmatpush.msra.mxu0 %v1588_v18 }
 0x4bf   :  { %1600 = vmatpush.msra.mxu0 %v1587_v19 }
 0x4c1   :  { %1601 = vmatpush.msra.mxu0 %v1586_v15 }
 0x4c2   :  { %v1721_v58 = vpop.eup %1720 }
 0x4c3   :  { %v1388_v6 = vmul.f32 %v1721_v58, %v1383_v55  ;;  %1602 = vmatpush.msra.mxu0 %v1585_v5 }
 0x4c5   :  { %1389 = vst [vmem:[#allocation2 + $0x6] sm:$0x1] %v1388_v6  ;;  %1474 = vmatmul.f32.vlgmr.msrb.gmra.mxu0 %v1388_v6  ;;  %1494 = vmatmul.f32.vlgmr.msrb.gmra.mxu1 %v1388_v6 }
 0x4c6   :  { %1514 = vmatmul.f32.vlgmr.msrb.gmra.mxu2 %v1388_v6  ;;  %1534 = vmatmul.f32.vlgmr.msrb.gmra.mxu3 %v1388_v6 }
 0x4c7   :  { %1603 = vmatpush.msra.mxu0 %v1584_v62 }
 0x4c9   :  { %1604 = vmatpush.msra.mxu0 %v1583_v10 }
 0x4cb   :  { %1605 = vmatpush.msra.mxu0 %v1582_v30 }
 0x4cd   :  { %1606 = vmatpush.msra.mxu0 %v1581_v39 }
 0x4cf   :  { %1607 = vmatpush.msra.mxu0 %v1580_v57 }
 0x4d1   :  { %1608 = vmatpush.msra.mxu0 %v1579_v12 }
 0x4d3   :  { %1609 = vmatpush.msra.mxu0 %v1578_v20 }
 0x4d5   :  { %1610 = vmatpush.msra.mxu0 %v1577_v46 }
 0x542   :  { %v1495_v59 = vpop.f32.mrf.mxu1  ;;  %v1475_v38 = vpop.f32.mrf.mxu0 }
 0x543   :  { %v1542_v14 = vrot.slane %v1495_v59, 7 }
 0x545   :  { %v1545_v42 = vsel %vm240_vm0, %v1475_v38, %v1542_v14 }
 0x549   :  { %v1515_v22 = vpop.f32.mrf.mxu2  ;;  %v1535_v27 = vpop.f32.mrf.mxu3 }
 0x54a   :  { %v1543_v31 = vrot.slane %v1515_v22, 6  ;;  %v1544_v35 = vrot.slane %v1535_v27, 5 }
 0x54c   :  { %v1546_v43 = vsel %vm242_vm1, %v1543_v31, %v1544_v35 }
 0x54d   :  { %v1547_v11 = vsel %vm244_vm2, %v1545_v42, %v1546_v43 }
 0x54e   :  { %v1549_v17 = vadd.f32 %v1547_v11, %v1393_v34 }
 0x550   :  { %v1550_v21 = vmul.f32 0.5, %v1549_v17  ;;  %v1555_v24 = vrot.slane %v1549_v17, 1  ;;  %v1564_v28 = vrot.slane %v1549_v17, 3  ;;  %v1561_v29 = vrot.slane %v1549_v17, 2 }
 0x552   :  { %1722 = vtanh.f32 %v1550_v21  ;;  %v1557_v25 = vmul.f32 0.5, %v1555_v24  ;;  %v1566_v32 = vmul.f32 0.5, %v1564_v28 }
 0x554   :  { %1724 = vtanh.f32 %v1557_v25 }
 0x555   :  { %1726 = vtanh.f32 %v1561_v29 }
 0x556   :  { %1728 = vtanh.f32 %v1566_v32 }
 0x558   :  { %v1723_v33 = vpop.eup %1722 }
 0x559   :  { %v1552_v36 = vmul.f32 0.5, %v1723_v33 }
 0x55a   :  { %v1725_v2 = vpop.eup %1724 }
 0x55b   :  { %v1553_v37 = vadd.f32 0.5, %v1552_v36  ;;  %v1559_v40 = vmul.f32 0.5, %v1725_v2  ;;  %v1727_v44 = vpop.eup %1726 }
 0x55c   :  { %v1729_v49 = vpop.eup %1728 }
 0x55d   :  { %v1560_v41 = vadd.f32 0.5, %v1559_v40  ;;  %v1571_v48 = vmul.f32 %v1727_v44, %v1553_v37  ;;  %v1568_v53 = vmul.f32 0.5, %v1729_v49 }
 0x55f   :  { %v1570_v45 = vmul.f32 %v1560_v41, %v2721_v50  ;;  %v1569_v54 = vadd.f32 0.5, %v1568_v53 }
 0x561   :  { %v1572_v52 = vadd.f32 %v1571_v48, %v1570_v45 }
 0x563   :  { %1730 = vtanh.f32 %v1572_v52 }
 0x569   :  { %v1731_v56 = vpop.eup %1730 }
 0x56a   :  { %v1574_v60 = vmul.f32 %v1731_v56, %v1569_v54 }
 0x56c   :  { %1575 = vst [vmem:[#allocation2 + $0x7] sm:$0x1] %v1574_v60 }
 0x573   :  { %v1576_v61 = vld [vmem:[#allocation2] sm:$0xff] }
 0x574   :  { %1611 = vmatmul.f32.vlgmr.msra.gmra.mxu0 %v1576_v61 }
 0x5f1   :  { %v1612_v8 = vpop.f32.mrf.mxu0 }
 0x5f2   :  { %v1613_v63 = vadd.f32 %v1612_v8, %v1594_v9 }
 0x5f4   :  { %1615 = vst [vmem:[#allocation12] sm:$0xff] %v1613_v63 }
 0x5f5   :  { %1626 = dma.vmem_to_hbm [thread:$0]  %s1622_s30, 128, %s1624_s9, [#allocation6]  }
 0x5f6   :  { %1848 = dma.done.wait [#allocation6], 128  }
 0x5f7   :  { %1849 = vsyncadd [#allocation6], 4294967168 }
 0x5f8   :  { %1631 = vsyncpa [#allocation5], 1 }
 0x5f9   :  { %1632 = vsyncpa [#allocation10], 1 }
 0x5fa   :  { %1633 = vsyncpa [#allocation6], 1 }
 0x5fb   :  { %1634 = vsyncpa [#allocation7], 1 }

</bundles_post_ra>
